<compile_context>
chip_gen: v7x
topology: tpu7x:2x2x1
jax: 0.10.0
libtpu: 0.0.40
codegen_flags: <defaults>
</compile_context>

<pallas_src>
import functools

import jax
import jax.numpy as jnp
from jax.experimental import pallas as pl
from jax.experimental.pallas import tpu as pltpu


def _round_up(x, m):
    return (x + m - 1) // m * m


def cnn_kernel(ids_ref, g_ref, bconv_ref, mask_ref, fcw_ref, fcb_ref, out_ref,
               *, seq, s_pad, fs_max, f_pad, v_pad, compute_dtype):
    """One batch tile of the fused TextCNN forward.

    ids_ref   : [Bb*S_pad, 1] int32    time-padded token ids (sentinel id -> zero row of G)
    g_ref     : [V_pad, fs_max*F_pad]  embedding table folded into all conv taps
    bconv_ref : [1, F_pad]             conv biases (branch-concatenated, zero-padded)
    mask_ref  : [S, F_pad]             1.0 where the time step is a valid conv output
    fcw_ref   : [F_pad, O_pad] ; fcb_ref : [1, O_pad]
    out_ref   : [Bb, O_pad]
    """
    m = ids_ref.shape[0]
    blk_b = m // s_pad

    # Embedding gather + every conv tap of every branch in ONE MXU matmul:
    # one_hot(ids) [M, V_pad] @ G [V_pad, fs_max*F_pad].  Padded time steps use
    # a sentinel id that selects an all-zero row of G, so they contribute 0.
    ids = ids_ref[...]                                            # [M, 1] int32
    vocab_iota = jax.lax.broadcasted_iota(jnp.int32, (m, v_pad), 1)
    onehot = (vocab_iota == ids).astype(compute_dtype)            # exact in bf16
    p = jnp.dot(onehot, g_ref[...], preferred_element_type=jnp.float32)
    p = p.reshape(blk_b, s_pad, fs_max * f_pad)                   # layout-free: s_pad % 8 == 0

    # Shift-and-add of the per-tap products.  Lane offsets are multiples of
    # F_pad=128, so these are whole-vreg adds plus cheap sublane shifts.
    conv = p[:, 0:seq, 0:f_pad]
    for k in range(1, fs_max):
        conv = conv + p[:, k:k + seq, k * f_pad:(k + 1) * f_pad]

    # Fused lane-dense epilogue: bias + ReLU + validity mask + max-pool.
    conv = jnp.maximum(conv + bconv_ref[...].reshape(1, 1, f_pad), 0.0)
    # Zero is a safe mask value: post-ReLU activations are >= 0 and every branch
    # has at least one valid time step (asserted in the wrapper), so masked
    # zeros never beat the true max.  Padded filter columns stay exactly zero.
    conv = conv * mask_ref[...][None, :, :]
    pooled = jnp.max(conv, axis=1)                                # [Bb, F_pad]; concat is free

    # Final Linear, lane-dense N = O_pad; padded rows/cols of fcw/fcb are zero.
    out = jnp.dot(pooled, fcw_ref[...], preferred_element_type=jnp.float32)
    out_ref[...] = out + fcb_ref[...]


def _pack_params(emb_table, conv_params, fc_w, fc_b, filter_sizes, seq, compute_dtype):
    """Fold the embedding table into one lane-aligned, lane-stacked conv RHS and
    build the bias / time-mask / padded FC operands."""
    n_branch = len(filter_sizes)
    n_filters, _, e_dim = conv_params[0][0].shape
    vocab = emb_table.shape[0]
    out_dim = fc_w.shape[1]

    fs_max = max(filter_sizes)
    f_tot = n_branch * n_filters
    f_pad = _round_up(f_tot, 128)       # lane-align every tap block (whole vregs)
    o_pad = _round_up(out_dim, 128)     # lane-dense output store
    v_pad = _round_up(vocab + 1, 128)   # +1 reserves a zero row for the time-pad sentinel

    w_big = jnp.zeros((e_dim, fs_max * f_pad), jnp.float32)
    b_big = jnp.zeros((1, f_pad), jnp.float32)
    mask = jnp.zeros((seq, f_pad), jnp.float32)
    for i, ((w, b), fs) in enumerate(zip(conv_params, filter_sizes)):
        lo = i * n_filters
        for k in range(fs):
            col = k * f_pad + lo
            w_big = w_big.at[:, col:col + n_filters].set(w[:, k, :].T)
        b_big = b_big.at[0, lo:lo + n_filters].set(b)
        mask = mask.at[:seq - fs + 1, lo:lo + n_filters].set(1.0)

    # Fold the embedding table into the conv weights (tiny at this vocab):
    # gather + conv become a single matmul with K = v_pad (>= 128).
    tab_pad = jnp.zeros((v_pad, e_dim), jnp.float32).at[:vocab, :].set(emb_table)
    g_big = (tab_pad @ w_big).astype(compute_dtype)               # [V_pad, fs_max*F_pad]

    fcw_pad = jnp.zeros((f_pad, o_pad), jnp.float32).at[:f_tot, :out_dim].set(fc_w)
    fcb_pad = jnp.zeros((1, o_pad), jnp.float32).at[0, :out_dim].set(fc_b)
    return g_big, b_big, mask, fcw_pad, fcb_pad, fs_max, f_pad, v_pad, o_pad


def _pick_block_b(batch, per_sample_bytes, vmem_budget=24 << 20):
    """Largest batch tile (multiple of 8, divisor of batch) under the VMEM
    budget, kept at >= 2 grid steps when possible so the 'parallel' batch axis
    actually shards over v7x's two TensorCores (harmless on v5e/v6e; single-TC
    chips that want one big step can pass block_b=batch explicitly)."""
    cap = max(8, (vmem_budget // max(per_sample_bytes, 1)) // 8 * 8)
    divisors = [d for d in range(8, batch + 1, 8) if batch % d == 0 and d <= cap]
    if not divisors:
        return batch                      # tiny / odd batch: single grid step
    block_b = max(divisors)
    if block_b == batch and batch // 2 in divisors:
        block_b = batch // 2
    return block_b


def cnn_forward(text, emb_table, conv_params, fc_w, fc_b, filter_sizes, *,
                block_b=None, compute_dtype=jnp.bfloat16):
    """text: [B,S] int32 token ids; emb_table: [V,E] f32; conv_params: list of
    (W[F,fs,E], b[F]); fc_w: [3F,O]; fc_b: [O].  Returns [B,O] f32 logits."""
    B, S = text.shape
    vocab = emb_table.shape[0]
    out_dim = fc_w.shape[1]
    assert S >= max(filter_sizes), "every conv branch needs >= 1 valid output step"

    (g_big, b_big, mask, fcw_pad, fcb_pad,
     fs_max, f_pad, v_pad, o_pad) = _pack_params(
         emb_table, conv_params, fc_w, fc_b, filter_sizes, S, compute_dtype)

    # Time-pad the *ids* (4 bytes/step, negligible HBM traffic — the old
    # [B,S,E] activation pad+cast pass is gone) so every shifted tap window is
    # in bounds; S_pad % 8 == 0 keeps the in-kernel reshape layout-free.
    # Sentinel id `vocab` hits an all-zero row of G.
    s_pad = _round_up(S + fs_max - 1, 8)
    ids = jnp.pad(text.astype(jnp.int32), ((0, 0), (0, s_pad - S)),
                  constant_values=vocab)
    ids_col = ids.reshape(B * s_pad, 1)

    # VMEM budget for the per-step intermediates (one-hot LHS, tap products,
    # conv accumulator) — keeps block_b safe on v7x's 64 MiB VMEM.
    cbytes = jnp.dtype(compute_dtype).itemsize
    per_sample = s_pad * (v_pad * cbytes + fs_max * f_pad * 4 + f_pad * 4)
    if block_b is None:
        block_b = _pick_block_b(B, per_sample)
    assert B % block_b == 0
    # Output block's second-minor dim must be a multiple of 8 or the full batch.
    assert block_b == B or block_b % 8 == 0
    grid = (B // block_b,)

    kernel = functools.partial(
        cnn_kernel, seq=S, s_pad=s_pad, fs_max=fs_max, f_pad=f_pad, v_pad=v_pad,
        compute_dtype=compute_dtype)

    # NOTE: the grid-invariant operands (g/bias/mask/fc) could be single-
    # buffered via pipeline_mode=pl.Buffered(1) to save a little VMEM on v7x;
    # left default-buffered here for portability across JAX versions.
    out_pad = pl.pallas_call(
        kernel,
        out_shape=jax.ShapeDtypeStruct((B, o_pad), jnp.float32),
        grid=grid,
        in_specs=[
            pl.BlockSpec((block_b * s_pad, 1), lambda b: (b, 0)),
            pl.BlockSpec(g_big.shape, lambda b: (0, 0)),
            pl.BlockSpec(b_big.shape, lambda b: (0, 0)),
            pl.BlockSpec(mask.shape, lambda b: (0, 0)),
            pl.BlockSpec(fcw_pad.shape, lambda b: (0, 0)),
            pl.BlockSpec(fcb_pad.shape, lambda b: (0, 0)),
        ],
        out_specs=pl.BlockSpec((block_b, o_pad), lambda b: (b, 0)),
        compiler_params=pltpu.CompilerParams(
            dimension_semantics=("parallel",),     # shards batch over v7x's 2 TCs
            vmem_limit_bytes=64 * 1024 * 1024),
    )(ids_col, g_big, b_big, mask, fcw_pad, fcb_pad)

    return out_pad[:, :out_dim]


def reference_forward(text, emb_table, conv_params, fc_w, fc_b, filter_sizes):
    """Plain-JAX f32 reference matching the PyTorch module's forward()."""
    emb = emb_table[text]                                         # [B,S,E] gather
    pooled = []
    for (w, b), fs in zip(conv_params, filter_sizes):
        T = emb.shape[1] - fs + 1
        acc = jnp.zeros((emb.shape[0], T, w.shape[0]), jnp.float32)
        for k in range(fs):
            acc = acc + jnp.einsum("bte,fe->btf", emb[:, k:k + T, :], w[:, k, :])
        acc = jnp.maximum(acc + b[None, None, :], 0.0)
        pooled.append(jnp.max(acc, axis=1))
    cat = jnp.concatenate(pooled, axis=1)
    return cat @ fc_w + fc_b[None, :]


if __name__ == "__main__":
    # Module hyperparameters (small, consistent with the PyTorch __init__).
    vocab_size = 50
    embedding_dim = 32
    n_filters = 8
    filter_sizes = (3, 4, 5)
    output_dim = 4
    pad_idx = 1
    batch, seq_len = 16, 16        # block_b=8 -> grid=(2,) parallel batch tiles

    key = jax.random.PRNGKey(0)
    k_emb, k_text, k_fc, *k_convs = jax.random.split(key, 3 + len(filter_sizes))

    # Deterministic parameter init (synthetic; no checkpoint loading).
    emb_table = 0.1 * jax.random.normal(k_emb, (vocab_size, embedding_dim), jnp.float32)
    emb_table = emb_table.at[pad_idx].set(0.0)   # nn.Embedding padding_idx row = 0

    conv_params = []
    for kc, fs in zip(k_convs, filter_sizes):
        w = 0.1 * jax.random.normal(kc, (n_filters, fs, embedding_dim), jnp.float32)
        b = 0.01 * jnp.arange(n_filters, dtype=jnp.float32)
        conv_params.append((w, b))

    fc_in = len(filter_sizes) * n_filters
    fc_w = 0.1 * jax.random.normal(k_fc, (fc_in, output_dim), jnp.float32)
    fc_b = 0.01 * jnp.arange(output_dim, dtype=jnp.float32)

    # Input token ids: [B, S] int32 (text_lengths_dummy is unused by forward()).
    text = jax.random.randint(k_text, (batch, seq_len), 0, vocab_size, dtype=jnp.int32)

    # Kernel (bf16 compute default, f32 accumulation) vs f32 reference.
    out = cnn_forward(text, emb_table, conv_params, fc_w, fc_b, filter_sizes)
    out = jax.block_until_ready(out)

    ref = reference_forward(text, emb_table, conv_params, fc_w, fc_b, filter_sizes)
    assert out.shape == (batch, output_dim)
    # Tolerance loosened for the bf16 inputs/weights (accumulation stays f32).
    assert jnp.allclose(out, ref, atol=1e-2, rtol=1e-2), (out, ref)

    print("KERNEL_OK")
</pallas_src>

<mosaic_0001>
module attributes {stable_mosaic.version = 11 : i64} {
  func.func @cnn_kernel(%arg0: i32, %arg1: memref<192x1xi32, #tpu.memory_space<vmem>>, %arg2: memref<128x640xbf16, #tpu.memory_space<vmem>>, %arg3: memref<1x128xf32, #tpu.memory_space<vmem>>, %arg4: memref<16x128xf32, #tpu.memory_space<vmem>>, %arg5: memref<128x128xf32, #tpu.memory_space<vmem>>, %arg6: memref<1x128xf32, #tpu.memory_space<vmem>>, %arg7: memref<8x128xf32, #tpu.memory_space<vmem>>) attributes {dimension_semantics = [#tpu.dimension_semantics<parallel>], iteration_bounds = array<i64: 2>, scalar_prefetch = 0 : i64, scratch_operands = 0 : i64, tpu.core_type = #tpu.core_type<tc>, window_params = [{transform_indices = @transform_0, window_bounds = array<i64: 192, 1>}, {pipeline_mode = #tpu.pipeline_mode<synchronous>, transform_indices = @transform_1, window_bounds = array<i64: 128, 640>}, {pipeline_mode = #tpu.pipeline_mode<synchronous>, transform_indices = @transform_2, window_bounds = array<i64: 1, 128>}, {pipeline_mode = #tpu.pipeline_mode<synchronous>, transform_indices = @transform_3, window_bounds = array<i64: 16, 128>}, {pipeline_mode = #tpu.pipeline_mode<synchronous>, transform_indices = @transform_4, window_bounds = array<i64: 128, 128>}, {pipeline_mode = #tpu.pipeline_mode<synchronous>, transform_indices = @transform_5, window_bounds = array<i64: 1, 128>}, {transform_indices = @transform_6, window_bounds = array<i64: 8, 128>}]} {
    %c0 = arith.constant 0 : index
    %c0_0 = arith.constant 0 : index
    %0 = vector.load %arg1[%c0, %c0_0] : memref<192x1xi32, #tpu.memory_space<vmem>>, vector<192x1xi32>
    %1 = tpu.iota {dimensions = array<i32: 1>} : vector<192x128xi32>
    %2 = vector.broadcast %0 : vector<192x1xi32> to vector<192x128xi32>
    %3 = arith.cmpi eq, %1, %2 : vector<192x128xi32>
    %4 = arith.extui %3 : vector<192x128xi1> to vector<192x128xi32>
    %5 = arith.sitofp %4 : vector<192x128xi32> to vector<192x128xf32>
    %6 = arith.truncf %5 : vector<192x128xf32> to vector<192x128xbf16>
    %c0_1 = arith.constant 0 : index
    %c0_2 = arith.constant 0 : index
    %7 = vector.load %arg2[%c0_1, %c0_2] : memref<128x640xbf16, #tpu.memory_space<vmem>>, vector<128x640xbf16>
    %cst = arith.constant dense<0.000000e+00> : vector<192x640xf32>
    %8 = tpu.matmul %6, %7, %cst {dimension_numbers = #tpu.dot_dimension_numbers<[1], [0], [0], [1], [0, 0, 1, 1], [], []>} : vector<192x128xbf16>, vector<128x640xbf16>, vector<192x640xf32> -> vector<192x640xf32>
    %9 = vector.shape_cast %8 : vector<192x640xf32> to vector<8x24x640xf32>
    %10 = vector.extract_strided_slice %9 {offsets = [0, 0, 0], sizes = [8, 16, 128], strides = [1, 1, 1]} : vector<8x24x640xf32> to vector<8x16x128xf32>
    %11 = vector.extract_strided_slice %9 {offsets = [0, 1, 128], sizes = [8, 16, 128], strides = [1, 1, 1]} : vector<8x24x640xf32> to vector<8x16x128xf32>
    %12 = arith.addf %10, %11 : vector<8x16x128xf32>
    %13 = vector.extract_strided_slice %9 {offsets = [0, 2, 256], sizes = [8, 16, 128], strides = [1, 1, 1]} : vector<8x24x640xf32> to vector<8x16x128xf32>
    %14 = arith.addf %12, %13 : vector<8x16x128xf32>
    %15 = vector.extract_strided_slice %9 {offsets = [0, 3, 384], sizes = [8, 16, 128], strides = [1, 1, 1]} : vector<8x24x640xf32> to vector<8x16x128xf32>
    %16 = arith.addf %14, %15 : vector<8x16x128xf32>
    %17 = vector.extract_strided_slice %9 {offsets = [0, 4, 512], sizes = [8, 16, 128], strides = [1, 1, 1]} : vector<8x24x640xf32> to vector<8x16x128xf32>
    %18 = arith.addf %16, %17 : vector<8x16x128xf32>
    %c0_3 = arith.constant 0 : index
    %c0_4 = arith.constant 0 : index
    %19 = vector.load %arg3[%c0_3, %c0_4] : memref<1x128xf32, #tpu.memory_space<vmem>>, vector<1x128xf32>
    %20 = vector.shape_cast %19 : vector<1x128xf32> to vector<1x1x128xf32>
    %21 = vector.broadcast %20 : vector<1x1x128xf32> to vector<8x16x128xf32>
    %22 = arith.addf %18, %21 : vector<8x16x128xf32>
    %cst_5 = arith.constant 0.000000e+00 : f32
    %23 = vector.broadcast %cst_5 : f32 to vector<8x16x128xf32>
    %24 = arith.maximumf %22, %23 : vector<8x16x128xf32>
    %c0_6 = arith.constant 0 : index
    %c0_7 = arith.constant 0 : index
    %25 = vector.load %arg4[%c0_6, %c0_7] : memref<16x128xf32, #tpu.memory_space<vmem>>, vector<16x128xf32>
    %26 = vector.shape_cast %25 : vector<16x128xf32> to vector<1x16x128xf32>
    %27 = vector.broadcast %26 : vector<1x16x128xf32> to vector<8x16x128xf32>
    %28 = arith.mulf %24, %27 : vector<8x16x128xf32>
    %cst_8 = arith.constant dense<0xFF800000> : vector<8x128xf32>
    %29 = vector.multi_reduction <maximumf>, %28, %cst_8 [1] : vector<8x16x128xf32> to vector<8x128xf32>
    %c0_9 = arith.constant 0 : index
    %c0_10 = arith.constant 0 : index
    %30 = vector.load %arg5[%c0_9, %c0_10] : memref<128x128xf32, #tpu.memory_space<vmem>>, vector<128x128xf32>
    %cst_11 = arith.constant dense<0.000000e+00> : vector<8x128xf32>
    %31 = tpu.matmul %29, %30, %cst_11 {dimension_numbers = #tpu.dot_dimension_numbers<[1], [0], [0], [1], [0, 0, 1, 1], [], []>} : vector<8x128xf32>, vector<128x128xf32>, vector<8x128xf32> -> vector<8x128xf32>
    %c0_12 = arith.constant 0 : index
    %c0_13 = arith.constant 0 : index
    %32 = vector.load %arg6[%c0_12, %c0_13] : memref<1x128xf32, #tpu.memory_space<vmem>>, vector<1x128xf32>
    %33 = vector.broadcast %32 : vector<1x128xf32> to vector<8x128xf32>
    %34 = arith.addf %31, %33 : vector<8x128xf32>
    %c0_14 = arith.constant 0 : index
    %c0_15 = arith.constant 0 : index
    %35 = vector.load %arg7[%c0_14, %c0_15] : memref<8x128xf32, #tpu.memory_space<vmem>>, vector<8x128xf32>
    tpu.vector_store %arg7[%c0_14, %c0_15], %34 {strides = array<i32>} : memref<8x128xf32, #tpu.memory_space<vmem>>, vector<8x128xf32>,
    return
  }
  func.func @transform_0(%arg0: i32) -> (i32, i32) {
    %c0_i32 = arith.constant 0 : i32
    %c0_i32_0 = arith.constant 0 : i32
    return %arg0, %c0_i32 : i32, i32
  }
  func.func @transform_1(%arg0: i32) -> (i32, i32) {
    %c0_i32 = arith.constant 0 : i32
    %c0_i32_0 = arith.constant 0 : i32
    %c0_i32_1 = arith.constant 0 : i32
    return %c0_i32, %c0_i32_0 : i32, i32
  }
  func.func @transform_2(%arg0: i32) -> (i32, i32) {
    %c0_i32 = arith.constant 0 : i32
    %c0_i32_0 = arith.constant 0 : i32
    %c0_i32_1 = arith.constant 0 : i32
    return %c0_i32, %c0_i32_0 : i32, i32
  }
  func.func @transform_3(%arg0: i32) -> (i32, i32) {
    %c0_i32 = arith.constant 0 : i32
    %c0_i32_0 = arith.constant 0 : i32
    %c0_i32_1 = arith.constant 0 : i32
    return %c0_i32, %c0_i32_0 : i32, i32
  }
  func.func @transform_4(%arg0: i32) -> (i32, i32) {
    %c0_i32 = arith.constant 0 : i32
    %c0_i32_0 = arith.constant 0 : i32
    %c0_i32_1 = arith.constant 0 : i32
    return %c0_i32, %c0_i32_0 : i32, i32
  }
  func.func @transform_5(%arg0: i32) -> (i32, i32) {
    %c0_i32 = arith.constant 0 : i32
    %c0_i32_0 = arith.constant 0 : i32
    %c0_i32_1 = arith.constant 0 : i32
    return %c0_i32, %c0_i32_0 : i32, i32
  }
  func.func @transform_6(%arg0: i32) -> (i32, i32) {
    %c0_i32 = arith.constant 0 : i32
    %c0_i32_0 = arith.constant 0 : i32
    return %arg0, %c0_i32 : i32, i32
  }
}

</mosaic_0001>

<bundles_post_ra>
// kernel: tpu_custom_call.1
= control target key start
LH: loop header
LB: loop body
LE: loop exit
PB: predicated region body
PF: predicated region fallthrough
CT: control target
= control target key end

     0   :  { %11 = vsyncpa [#allocation3], 0  ;;  %s3428_s0 = inlined_call_operand.hbm [shape: s32[384,1], index: 0, kind: input, shape index: {}]   ;;  %s3429_s1 = inlined_call_operand.hbm [shape: bf16[128,640], index: 1, kind: input, shape index: {}]   ;;  %s3430_s2 = inlined_call_operand.hbm [shape: f32[1,128], index: 2, kind: input, shape index: {}]   ;;  %s3431_s3 = inlined_call_operand.hbm [shape: f32[16,128], index: 3, kind: input, shape index: {}]   ;;  %s3432_s4 = inlined_call_operand.hbm [shape: f32[128,128], index: 4, kind: input, shape index: {}]   ;;  %s3433_s5 = inlined_call_operand.hbm [shape: f32[1,128], index: 5, kind: input, shape index: {}]   ;;  %s3434_s6 = inlined_call_operand.hbm [shape: f32[16,128], index: 6, kind: output, shape index: {}]  }
   0x1   :  { %13 = vsyncpa [#allocation3 + $0x1], 0 }
   0x2   :  { %14 = vsyncpa [#allocation6], 0 }
   0x3   :  { %15 = vsyncpa [#allocation9], 0 }
   0x4   :  { %16 = vsyncpa [#allocation12], 0 }
   0x5   :  { %17 = vsyncpa [#allocation4], 0 }
   0x6   :  { %19 = vsyncpa [#allocation4 + $0x1], 0  ;;  %s2734_s21 = smov 0   ;;  %s2736_s22 = smov 0  }
   0x7   :  { %s2738_s23 = smov 0   ;;  %s2740_s24 = smov 0  }
   0x8 LB: > { %s2683_s25 = smov [#allocation5]   ;;  %s2755_s27 = sadd.s32 4294967295, %s2681_s24   ;;  %s2681_s24 = sphi %s2740_s24, %s3485_s24   ;;  %s2677_s23 = sphi %s2738_s23, %s3484_s23   ;;  %s2673_s22 = sphi %s2736_s22, %s3483_s22   ;;  %s2669_s21 = sphi %s2734_s21, %s3482_s21  }
   0x9   : > { %s199_s26 = sshll.u32 %s2683_s25, 4  ;;  %p1957_p0 = scmp.ge.s32.totalorder %s2681_s24, 1  ;;  %s2760_s26 = int_to_ptr.vmem [resolvable:$true] %s199_s26 }
   0xa   : > { %p3435_p1 = scmp.eq.s32.totalorder %s2755_s27, 0  ;;  %p187_p2 = scmp.lt.s32.totalorder %s2681_s24, 3 }
   0xb   : > { %s2684_s29 = smov [#allocation8]   ;;  %s2685_s8 = smov [#allocation7]  }
   0xc   : > { %p2762_p3 = pnand %p1957_p0, %p187_p2  ;;  %s223_s30 = sshll.u32 %s2684_s29, 4  ;;  %s2775_s30 = int_to_ptr.vmem [resolvable:$true] %s223_s30 }
   0xd   : > { %s2777_s9 = sshll.u32 %s2685_s8, 4  ;;  %s2433_s12 = scalar_lea.hbm %s3429_s1, 5120  ;;  %s214_s9 = int_to_ptr.vmem [resolvable:$true] %s2777_s9 }
   0xe   : > { %s3440_s28 = scalar_select %p2762_p3, 1, 0 }
   0xf   : > { %p2293_p5 = pneg %p2762_p3  ;;  %p2434_p7 = scmp.ne.s32.totalorder %s3429_s1, %s2433_s12 }
  0x10   : > { %p2440_p11 = scmp.lt.u32.totalorder %s2433_s12, %s3429_s1 }
  0x11   : > { %p2771_p6 = pnand %p2293_p5, %p3435_p1 }
  0x13   : > { %p2787_p8 = pneg %p2771_p6 }
  0x15   : > { %p2436_p9 = pnand %p2787_p8, %p2434_p7 }
  0x17   : > { %p2437_p10 = pneg %p2436_p9 }
  0x19   : > { %p2442_p12 = pnand %p2440_p11, %p2437_p10 }
  0x1b   : > { %2445 = shalt.err (!%p2442_p12)
}
  0x1c   : > { %s2446_s18 = scalar_lea.vmem %s2760_s26, 5120  ;;  %p2454_p5 = scmp.lt.s32.totalorder %s2760_s26, %s2760_s26 }
  0x1d   : > { %p2447_p13 = scmp.ne.s32.totalorder %s2760_s26, %s2446_s18  ;;  %p2455_p4 = scmp.lt.s32.totalorder %s2446_s18, %s2446_s18 }
  0x1f   : > { %p2449_p0 = pnand %p2447_p13, %p2787_p8  ;;  %p2456_p7 = por %p2455_p4, %p2454_p5 }
  0x21   : > { %p2450_p2 = pneg %p2449_p0 }
  0x23   : > { %p2457_p9 = pnand %p2456_p7, %p2450_p2 }
  0x25   : > { %2460 = shalt.err (!%p2457_p9)
}
  0x26   : > { %s2686_s19 = smov 320   ;;  %s2687_s20 = smov 20  }
  0x27   : > { %2296 = dma.hbm_to_vmem [thread:$0]  (!%p2771_p6), %s3429_s1, 5120, %s2760_s26, [#allocation6], %s2686_s19, %s2686_s19, %s2687_s20  }
  0x28   : > { %s2461_s11 = scalar_lea.hbm %s3431_s3, 256 }
  0x29   : > { %p2462_p4 = scmp.ne.s32.totalorder %s3431_s3, %s2461_s11  ;;  %p2468_p12 = scmp.lt.u32.totalorder %s2461_s11, %s3431_s3 }
  0x2b   : > { %p2464_p10 = pnand %p2462_p4, %p2787_p8 }
  0x2d   : > { %p2465_p11 = pneg %p2464_p10 }
  0x2f   : > { %p2470_p13 = pnand %p2468_p12, %p2465_p11 }
  0x31   : > { %2473 = shalt.err (!%p2470_p13)
}
  0x32   : > { %s2474_s26 = scalar_lea.vmem %s2775_s30, 256  ;;  %p2482_p7 = scmp.lt.s32.totalorder %s2775_s30, %s2775_s30 }
  0x33   : > { %p2475_p0 = scmp.ne.s32.totalorder %s2775_s30, %s2474_s26  ;;  %p2483_p9 = scmp.lt.s32.totalorder %s2474_s26, %s2474_s26 }
  0x35   : > { %p2477_p2 = pnand %p2475_p0, %p2787_p8  ;;  %p2484_p4 = por %p2483_p9, %p2482_p7 }
  0x37   : > { %p2478_p5 = pneg %p2477_p2 }
  0x39   : > { %p2485_p10 = pnand %p2484_p4, %p2478_p5 }
  0x3b   : > { %2488 = shalt.err (!%p2485_p10)
}
  0x3c   : > { %s3437_s17 = smov 128   ;;  %s3438_s18 = smov 8  }
  0x3d   : > { %2302 = dma.hbm_to_vmem [thread:$0]  (!%p2771_p6), %s3431_s3, 256, %s2775_s30, [#allocation9], %s3437_s17, %s3437_s17, %s3438_s18  }
  0x3e   : > { %s2489_s8 = scalar_lea.hbm %s3430_s2, 16 }
  0x3f   : > { %p2490_p11 = scmp.ne.s32.totalorder %s3430_s2, %s2489_s8  ;;  %p2496_p0 = scmp.lt.u32.totalorder %s2489_s8, %s3430_s2 }
  0x41   : > { %p2492_p12 = pnand %p2490_p11, %p2787_p8 }
  0x43   : > { %p2493_p13 = pneg %p2492_p12 }
  0x45   : > { %p2498_p2 = pnand %p2496_p0, %p2493_p13 }
  0x47   : > { %2501 = shalt.err (!%p2498_p2)
}
  0x48   : > { %s2502_s14 = scalar_lea.vmem %s214_s9, 16  ;;  %s2509_s30 = scalar_lea.vmem %s214_s9, 32 }
  0x49   : > { %p2503_p5 = scmp.ne.s32.totalorder %s214_s9, %s2502_s14  ;;  %p2510_p4 = scmp.lt.s32.totalorder %s214_s9, %s214_s9 }
  0x4a   : > { %p2511_p10 = scmp.lt.s32.totalorder %s2509_s30, %s2502_s14 }
  0x4b   : > { %p2505_p7 = pnand %p2503_p5, %p2787_p8 }
  0x4c   : > { %p2512_p1 = por %p2511_p10, %p2510_p4 }
  0x4d   : > { %p2506_p9 = pneg %p2505_p7 }
  0x4f   : > { %p2513_p3 = pnand %p2512_p1, %p2506_p9 }
  0x51   : > { %2516 = shalt.err (!%p2513_p3)
}
  0x52   : > { %2299 = dma.hbm_to_vmem [thread:$0]  (!%p2771_p6), %s3430_s2, 16, %s214_s9, [#allocation6]  }
  0x53   : > { %s2690_s19 = smov [#allocation10]   ;;  %s2691_s25 = smov [#allocation11]  }
  0x54   : > { %s236_s20 = sshll.u32 %s2690_s19, 4  ;;  %s250_s29 = sshll.u32 %s2691_s25, 4  ;;  %s237_s20 = int_to_ptr.vmem [resolvable:$true] %s236_s20  ;;  %s251_s29 = int_to_ptr.vmem [resolvable:$true] %s250_s29 }
  0x55   : > { %s2517_s11 = scalar_lea.hbm %s3432_s4, 2048 }
  0x56   : > { %p2518_p1 = scmp.ne.s32.totalorder %s3432_s4, %s2517_s11  ;;  %p2524_p12 = scmp.lt.u32.totalorder %s2517_s11, %s3432_s4 }
  0x58   : > { %p2520_p3 = pnand %p2518_p1, %p2787_p8 }
  0x5a   : > { %p2521_p11 = pneg %p2520_p3 }
  0x5c   : > { %p2526_p13 = pnand %p2524_p12, %p2521_p11 }
  0x5e   : > { %2529 = shalt.err (!%p2526_p13)
}
  0x5f   : > { %s2530_s9 = scalar_lea.vmem %s237_s20, 2048  ;;  %p2538_p7 = scmp.lt.s32.totalorder %s237_s20, %s237_s20 }
  0x60   : > { %p2531_p0 = scmp.ne.s32.totalorder %s237_s20, %s2530_s9  ;;  %p2539_p9 = scmp.lt.s32.totalorder %s2530_s9, %s2530_s9 }
  0x62   : > { %p2533_p2 = pnand %p2531_p0, %p2787_p8  ;;  %p2540_p4 = por %p2539_p9, %p2538_p7 }
  0x64   : > { %p2534_p5 = pneg %p2533_p2 }
  0x66   : > { %p2541_p10 = pnand %p2540_p4, %p2534_p5 }
  0x68   : > { %2544 = shalt.err (!%p2541_p10)
}
  0x69   : > { %2305 = dma.hbm_to_vmem [thread:$0]  (!%p2771_p6), %s3432_s4, 2048, %s237_s20, [#allocation9], %s3437_s17, %s3437_s17, %s3438_s18  }
  0x6a   : > { %s2545_s8 = scalar_lea.hbm %s3433_s5, 16 }
  0x6b   : > { %p2546_p1 = scmp.ne.s32.totalorder %s3433_s5, %s2545_s8  ;;  %p2552_p12 = scmp.lt.u32.totalorder %s2545_s8, %s3433_s5 }
  0x6d   : > { %p2548_p3 = pnand %p2546_p1, %p2787_p8 }
  0x6f   : > { %p2549_p11 = pneg %p2548_p3 }
  0x71   : > { %p2554_p13 = pnand %p2552_p12, %p2549_p11 }
  0x73   : > { %2557 = shalt.err (!%p2554_p13)
}
  0x74   : > { %s2558_s14 = scalar_lea.vmem %s251_s29, 16  ;;  %s2565_s20 = scalar_lea.vmem %s251_s29, 32 }
  0x75   : > { %p2559_p0 = scmp.ne.s32.totalorder %s251_s29, %s2558_s14  ;;  %p2566_p7 = scmp.lt.s32.totalorder %s251_s29, %s251_s29 }
  0x76   : > { %p2567_p9 = scmp.lt.s32.totalorder %s2565_s20, %s2558_s14 }
  0x77   : > { %p2561_p2 = pnand %p2559_p0, %p2787_p8 }
  0x78   : > { %p2568_p4 = por %p2567_p9, %p2566_p7 }
  0x79   : > { %p2562_p5 = pneg %p2561_p2 }
  0x7b   : > { %p2569_p10 = pnand %p2568_p4, %p2562_p5 }
  0x7d   : > { %2572 = shalt.err (!%p2569_p10)
}
  0x7e   : > { %2308 = dma.hbm_to_vmem [thread:$0]  (!%p2771_p6), %s3433_s5, 16, %s251_s29, [#allocation12]  }
  0x7f   : > { %s1956_s15 = sadd.s32 4294967294, %s2681_s24   ;;  %s2894_s7 = sadd.s32 1, %s2681_s24  }
  0x80   : > { %s32_s16 = sadd.s32 1, %s2677_s23  ;;  %s29_s26 = ssub.s32 %s2681_s24, %s2894_s7 }
  0x81   : > { %p39_p8 = scmp.ne.s32.totalorder %s2677_s23, %s2673_s22  ;;  %p30_p1 = scmp.eq.s32.totalorder %s29_s26, 0 }
  0x82   : > { %p40_p3 = scmp.eq.s32.totalorder %s2681_s24, 0  ;;  %p45_p11 = scmp.ne.s32.totalorder %s2673_s22, %s2669_s21 }
  0x83   : > { %p174_p12 = scmp.eq.s32.totalorder %s2755_s27, 1  ;;  %p3443_p0 = scmp.eq.s32.totalorder %s2755_s27, 0 }
  0x84   : > { %s2906_s19 = scalar_select %p30_p1, %s2677_s23, %s32_s16  }
  0x85   : > { %p41_p13 = por %p40_p3, %p39_p8  ;;  %p2910_p2 = por %p3443_p0, %p45_p11 }
  0x86   : > { %p2914_p6 = por %p174_p12, %p39_p8  ;;  %p180_p5 = scmp.eq.s32.totalorder %s1956_s15, 1 }
  0x87   : > { %p2322_p7 = scmp.lt.s32.totalorder %s2681_s24, 2  ;;  %s261_s8 = sand.u32 1, %s2677_s23  }
  0x88   : > { %s3445_s29 = scalar_select %p2914_p6, 1, 0 }
  0x89   : > { %p2920_p9 = por %p180_p5, %p45_p11  ;;  %s2267_s11 = smul.u32 192, %s261_s8 }
  0x8a   : > { %p2924_p4 = pnand %p2322_p7, %p41_p13  ;;  %s2114_s13 = smul.u32 3072, %s2681_s24 }
  0x8b   : > { %s3446_s10 = scalar_select %p2920_p9, 1, 0 }
  0x8c   : > { %s2932_s30 = scalar_lea.hbm %s3428_s0, %s2114_s13  ;;  %s265_s9 = scalar_lea.vmem [#allocation2], %s2267_s11 }
  0x8d   : > { %s272_s15 = sshll.u32 %s265_s9, 4  ;;  %s2936_s16 = scalar_lea.sflag [#allocation3], %s261_s8  ;;  %s2934_s15 = int_to_ptr.vmem [resolvable:$true] %s272_s15 }
  0x8e   : > { %s2573_s26 = scalar_lea.hbm %s2932_s30, 3072  ;;  %p2575_p8 = pneg %p2924_p4 }
  0x8f   : > { %p2574_p10 = scmp.ne.s32.totalorder %s2932_s30, %s2573_s26  ;;  %s2578_s20 = scalar_lea.hbm %s3428_s0, 6144 }
  0x90   : > { %p2579_p11 = scmp.lt.u32.totalorder %s2932_s30, %s3428_s0  ;;  %p2580_p12 = scmp.lt.u32.totalorder %s2578_s20, %s2573_s26 }
  0x91   : > { %p2576_p1 = pnand %p2575_p8, %p2574_p10  ;;  %p2582_p0 = scmp.lt.u32.totalorder %s2573_s26, %s2932_s30 }
  0x92   : > { %p2581_p13 = por %p2580_p12, %p2579_p11 }
  0x93   : > { %p2577_p3 = pneg %p2576_p1 }
  0x94   : > { %p2583_p5 = por %p2582_p0, %p2581_p13 }
  0x96   : > { %p2584_p7 = pnand %p2583_p5, %p2577_p3 }
  0x98   : > { %2587 = shalt.err (!%p2584_p7)
}
  0x99   : > { %s2588_s8 = scalar_lea.vmem %s2934_s15, 3072  ;;  %s2692_s11 = smov [#allocation2]  }
  0x9a   : > { %p2589_p10 = scmp.ne.s32.totalorder %s2934_s15, %s2588_s8  ;;  %s2593_s9 = sshll.u32 %s2692_s11, 4  ;;  %s2594_s9 = int_to_ptr.vmem [resolvable:$false] %s2593_s9 }
  0x9b   : > { %s2595_s17 = scalar_lea.vmem %s2594_s9, 6144  ;;  %p2596_p6 = scmp.lt.s32.totalorder %s2934_s15, %s2594_s9 }
  0x9c   : > { %p2591_p1 = pnand %p2589_p10, %p2575_p8  ;;  %p2597_p11 = scmp.lt.s32.totalorder %s2595_s17, %s2588_s8 }
  0x9e   : > { %p2592_p9 = pneg %p2591_p1  ;;  %p2598_p12 = por %p2597_p11, %p2596_p6 }
  0xa0   : > { %p2599_p13 = pnand %p2598_p12, %p2592_p9 }
  0xa2   : > { %2602 = shalt.err (!%p2599_p13)
}
  0xa3   : > { %s3448_s18 = smov 8   ;;  %s3449_s26 = smov 128  }
  0xa4   : > { %2312 = dma.hbm_to_vmem [thread:$0]  (!%p2924_p4), %s2932_s30, 3072, %s2934_s15, %s2936_s16, %s3449_s26, %s3449_s26, %s3448_s18  }
  0xa5   : > { %p3450_p8 = scmp.ne.s32.totalorder %s3440_s28, 0 }
  0xa6   : > { %s2970_s13 = sand.u32 (!%p3450_p8), 1, %s2673_s22  }
  0xa7   : > { %284 = sbr.rel (%p3450_p8) target bundleno = 917 (0x395), region = 44  ;;  %s287_s20 = scalar_lea.sflag (!%p3450_p8), [#allocation3], %s2970_s13 }
  0xa8   : > { %s2268_s14 = smul.u32 (!%p3450_p8), 192, %s2970_s13 }
  0xaa   : > { %s2974_s8 = scalar_lea.vmem (!%p3450_p8), [#allocation2], %s2268_s14 }
  0xae   : > { %2648 = dma.done.wait (%p2910_p2), %s287_s20, 3072  }
  0xaf   : > { %2650 = vsyncadd (%p2910_p2), %s287_s20, 4294964224  ;;  %p3451_p6 = scmp.eq.s32.totalorder %s2755_s27, 0 }
  0xb1   : > { %2652 = dma.done.wait (%p3451_p6), [#allocation6], 5136   ;;  %p3452_p9 = pmov %p3451_p6 }
  0xb2   : > { %p3453_p4 = pmov %p3451_p6 }
  0xb3   : > { %2654 = vsyncadd (%p3452_p9), [#allocation6], 4294962160 }
  0xb4   : > { %2656 = dma.done.wait (%p3453_p4), [#allocation9], 2304   ;;  %p3454_p3 = pmov %p3453_p4 }
  0xb6   : > { %2658 = vsyncadd (%p3454_p3), [#allocation9], 4294964992  ;;  %p3455_p0 = pmov %p3454_p3 }
  0xb8   : > { %2660 = dma.done.wait (%p3455_p0), [#allocation12], 16   ;;  %p3456_p5 = pmov %p3455_p0 }
  0xb9   : > { %v2693_v0 = vmov 0   ;;  %v343_v1 = vld [vmem:[%s2974_s8 + $0x10] sm:$0xff]  ;;  %v341_v2 = vld [vmem:[%s2974_s8] sm:$0xff]  ;;  %v344_v3 = vld [vmem:[%s2974_s8 + $0x18] sm:$0xff]  ;;  %v365_v58 = vlaneseq  ;;  %s1971_s28 = sshll.u32 %s2970_s13, 3  ;;  %s2111_s25 = sshll.u32 %s2755_s27, 7 }
  0xba   : > { %2662 = vsyncadd (%p3456_p5), [#allocation12], 4294967280  ;;  %2376 = vset.pattern.permute.xlu1 %v2693_v0  ;;  %2375 = vset.pattern.permute.xlu0 %v2693_v0  ;;  %v342_v4 = vld [vmem:[%s2974_s8 + $0x8] sm:$0xff]  ;;  %v345_v6 = vld [vmem:[%s2974_s8 + $0x20] sm:$0xff]  ;;  %s338_s12 = scalar_lea.vmem [#allocation13], %s1971_s28  ;;  %s3384_s11 = scalar_lea.hbm %s3434_s6, %s2111_s25 }
  0xbb   : > { %811 = vmatprep.mubr.bf16.mxu0 %v2693_v0  ;;  %956 = vmatprep.mubr.bf16.mxu1 %v2693_v0  ;;  %v346_v5 = vld [vmem:[%s2974_s8 + $0x28] sm:$0xff]  ;;  %v348_v7 = vld [vmem:[%s2974_s8 + $0x38] sm:$0xff]  ;;  %v347_v8 = vld [vmem:[%s2974_s8 + $0x30] sm:$0xff]  ;;  %v3020_v60 = vand.u32 127, %v365_v58  ;;  %s1838_s30 = sshll.u32 %s338_s12, 4  ;;  %s1825_s9 = scalar_lea.sflag [#allocation4], %s2970_s13  ;;  %s3386_s30 = int_to_ptr.vmem [resolvable:$true] %s1838_s30 }
  0xbc   : > { %374 = vperm.xlu1 %2376, %v343_v1   ;;  %368 = vperm.xlu0 %2375, %v341_v2   ;;  %v2377_v9 = vld [vmem:[#allocation5 + $0xc] ss:$20 sps:$4 sm:$0xff]   ;;  %v2379_v10 = vld [vmem:[#allocation5 + $0x4] ss:$20 sps:$4 sm:$0xff]   ;;  %v2381_v11 = vld [vmem:[#allocation5 + $0x8] ss:$20 sps:$4 sm:$0xff]  }
  0xbd   : > { %924 = vmatprep.subr.bf16.mxu1 %v2377_v9  ;;  %v2382_v12 = vld [vmem:[#allocation5] ss:$20 sps:$4 sm:$0xff]   ;;  %779 = vmatprep.subr.bf16.mxu0 %v2379_v10  ;;  %v350_v14 = vld [vmem:[%s2974_s8 + $0x48] sm:$0xff]  ;;  %v2387_v17 = vld [vmem:[#allocation5 + $0x30] ss:$20 sps:$4 sm:$0xff]   ;;  %s2603_s17 = scalar_lea.vmem %s3386_s30, 128 }
  0xbe   : > { %v2383_v13 = vld [vmem:[#allocation5 + $0x34] ss:$20 sps:$4 sm:$0xff]   ;;  %v349_v15 = vld [vmem:[%s2974_s8 + $0x40] sm:$0xff]  ;;  %925 = vmatpush1.bf16.msra.mxu1 %v2381_v11  ;;  %780 = vmatpush1.bf16.msra.mxu0 %v2382_v12  ;;  %v2389_v19 = vld [vmem:[#allocation5 + $0x5c] ss:$20 sps:$4 sm:$0xff]   ;;  %p2604_p2 = scmp.ne.s32.totalorder %s3386_s30, %s2603_s17  ;;  %p3479_p7 = scmp.ne.s32.totalorder %s3445_s29, 0 }
  0xbf   : > { %v2385_v16 = vld [vmem:[#allocation5 + $0x2c] ss:$20 sps:$4 sm:$0xff]   ;;  %v2388_v18 = vld [vmem:[#allocation5 + $0x28] ss:$20 sps:$4 sm:$0xff]   ;;  %926 = vmatprep.subr.bf16.mxu1 %v2383_v13  ;;  %v2394_v23 = vld [vmem:[#allocation5 + $0x50] ss:$20 sps:$4 sm:$0xff]  }
  0xc0   : > { %377 = vperm.xlu1 %2376, %v344_v3   ;;  %371 = vperm.xlu0 %2375, %v342_v4   ;;  %v2391_v20 = vld [vmem:[#allocation5 + $0x54] ss:$20 sps:$4 sm:$0xff]   ;;  %v2393_v21 = vld [vmem:[#allocation5 + $0x58] ss:$20 sps:$4 sm:$0xff]   ;;  %v2397_v26 = vld [vmem:[#allocation5 + $0x7c] ss:$20 sps:$4 sm:$0xff]   ;;  %p2605_p10 = pnand %p2604_p2, %p3479_p7 }
  0xc1   : > { %781 = vmatprep.subr.bf16.mxu0 %v2385_v16  ;;  %v352_v22 = vld [vmem:[%s2974_s8 + $0x58] sm:$0xff]  ;;  %v351_v24 = vld [vmem:[%s2974_s8 + $0x50] sm:$0xff]  ;;  %v354_v27 = vld [vmem:[%s2974_s8 + $0x68] sm:$0xff]  ;;  %v2694_v2 = vmov 1.0|1.0   ;;  %s2698_s27 = smov [#allocation13]  }
  0xc2   : > { %927 = vmatpush1.bf16.msra.mxu1 %v2387_v17  ;;  %782 = vmatpush1.bf16.msra.mxu0 %v2388_v18  ;;  %v2395_v25 = vld [vmem:[#allocation5 + $0x84] ss:$20 sps:$4 sm:$0xff]   ;;  %v2399_v29 = vld [vmem:[#allocation5 + $0x80] ss:$20 sps:$4 sm:$0xff]   ;;  %v2405_v33 = vld [vmem:[#allocation5 + $0xa8] ss:$20 sps:$4 sm:$0xff]   ;;  %p2606_p1 = pneg %p2605_p10 }
  0xc3   : > { %928 = vmatprep.subr.bf16.mxu1 %v2389_v19  ;;  %783 = vmatprep.subr.bf16.mxu0 %v2391_v20  ;;  %v353_v28 = vld [vmem:[%s2974_s8 + $0x60] sm:$0xff]  ;;  %v2400_v30 = vld [vmem:[#allocation5 + $0x78] ss:$20 sps:$4 sm:$0xff]   ;;  %v355_v36 = vld [vmem:[%s2974_s8 + $0x70] sm:$0xff]  ;;  %s2607_s18 = sshll.u32 %s2698_s27, 4  ;;  %s2608_s18 = int_to_ptr.vmem [resolvable:$false] %s2607_s18 }
  0xc4   : > { %383 = vperm.xlu1 %2376, %v346_v5   ;;  %380 = vperm.xlu0 %2375, %v345_v6   ;;  %v2401_v31 = vld [vmem:[#allocation5 + $0xac] ss:$20 sps:$4 sm:$0xff]   ;;  %v2403_v32 = vld [vmem:[#allocation5 + $0xa4] ss:$20 sps:$4 sm:$0xff]   ;;  %v2407_v37 = vld [vmem:[#allocation5 + $0xd4] ss:$20 sps:$4 sm:$0xff]   ;;  %p2610_p11 = scmp.lt.s32.totalorder %s3386_s30, %s2608_s18 }
  0xc5   : > { %v356_v34 = vld [vmem:[%s2974_s8 + $0x78] sm:$0xff]  ;;  %v2406_v35 = vld [vmem:[#allocation5 + $0xa0] ss:$20 sps:$4 sm:$0xff]   ;;  %v2411_v39 = vld [vmem:[#allocation5 + $0xd0] ss:$20 sps:$4 sm:$0xff]   ;;  %s2609_s26 = scalar_lea.vmem %s2608_s18, 256 }
  0xc6   : > { %929 = vmatpush1.bf16.msra.mxu1 %v2393_v21  ;;  %784 = vmatpush1.bf16.msra.mxu0 %v2394_v23  ;;  %v2409_v38 = vld [vmem:[#allocation5 + $0xcc] ss:$20 sps:$4 sm:$0xff]   ;;  %v2412_v42 = vld [vmem:[#allocation5 + $0xc8] ss:$20 sps:$4 sm:$0xff]   ;;  %v2418_v46 = vld [vmem:[#allocation5 + $0xf0] ss:$20 sps:$4 sm:$0xff]   ;;  %p2611_p12 = scmp.lt.s32.totalorder %s2609_s26, %s2603_s17 }
  0xc7   : > { %930 = vmatprep.subr.bf16.mxu1 %v2395_v25  ;;  %785 = vmatprep.subr.bf16.mxu0 %v2397_v26  ;;  %v358_v40 = vld [vmem:[%s2974_s8 + $0x88] sm:$0xff]  ;;  %v357_v41 = vld [vmem:[%s2974_s8 + $0x80] sm:$0xff]  ;;  %v2413_v43 = vld [vmem:[#allocation5 + $0xfc] ss:$20 sps:$4 sm:$0xff]  }
  0xc8   : > { %389 = vperm.xlu1 %2376, %v348_v7   ;;  %386 = vperm.xlu0 %2375, %v347_v8   ;;  %v2415_v44 = vld [vmem:[#allocation5 + $0xf4] ss:$20 sps:$4 sm:$0xff]   ;;  %v2417_v45 = vld [vmem:[#allocation5 + $0xf8] ss:$20 sps:$4 sm:$0xff]   ;;  %v2421_v50 = vld [vmem:[#allocation5 + $0x11c] ss:$20 sps:$4 sm:$0xff]   ;;  %p2612_p13 = por %p2611_p12, %p2610_p11 }
  0xc9   : > { %v360_v47 = vld [vmem:[%s2974_s8 + $0x98] sm:$0xff]  ;;  %v359_v48 = vld [vmem:[%s2974_s8 + $0x90] sm:$0xff]  ;;  %v362_v53 = vld [vmem:[%s2974_s8 + $0xa8] sm:$0xff] }
  0xca   : > { %931 = vmatpush1.bf16.msra.mxu1 %v2399_v29  ;;  %786 = vmatpush1.bf16.msra.mxu0 %v2400_v30  ;;  %v2419_v49 = vld [vmem:[#allocation5 + $0x124] ss:$20 sps:$4 sm:$0xff]   ;;  %v2423_v51 = vld [vmem:[#allocation5 + $0x120] ss:$20 sps:$4 sm:$0xff]   ;;  %v2428_v6 = vld [vmem:[#allocation5 + $0x88] ss:$20 sps:$4 sm:$0xff]   ;;  %p2613_p8 = pnand %p2612_p13, %p2606_p1 }
  0xcb   : > { %932 = vmatprep.subr.bf16.mxu1 %v2401_v31  ;;  %787 = vmatprep.subr.bf16.mxu0 %v2403_v32  ;;  %v2424_v52 = vld [vmem:[#allocation5 + $0x118] ss:$20 sps:$4 sm:$0xff]   ;;  %v361_v54 = vld [vmem:[%s2974_s8 + $0xa0] sm:$0xff]  ;;  %v363_v57 = vld [vmem:[%s2974_s8 + $0xb0] sm:$0xff] }
  0xcc   : > { %395 = vperm.xlu1 %2376, %v350_v14   ;;  %392 = vperm.xlu0 %2375, %v349_v15   ;;  %v2425_v55 = vld [vmem:[#allocation5 + $0x10] ss:$20 sps:$4 sm:$0xff]   ;;  %v364_v56 = vld [vmem:[%s2974_s8 + $0xb8] sm:$0xff]  ;;  %v2427_v3 = vld [vmem:[#allocation5 + $0x60] ss:$20 sps:$4 sm:$0xff]  }
  0xcd   : > { %v2426_v1 = vld [vmem:[#allocation5 + $0x38] ss:$20 sps:$4 sm:$0xff]   ;;  %v2429_v9 = vld [vmem:[#allocation5 + $0xb0] ss:$20 sps:$4 sm:$0xff]   ;;  %v2431_v14 = vld [vmem:[#allocation5 + $0x100] ss:$20 sps:$4 sm:$0xff]  }
  0xce   : > { %933 = vmatpush1.bf16.msra.mxu1 %v2405_v33  ;;  %788 = vmatpush1.bf16.msra.mxu0 %v2406_v35  ;;  %v2430_v11 = vld [vmem:[#allocation5 + $0xd8] ss:$20 sps:$4 sm:$0xff]   ;;  %v2432_v16 = vld [vmem:[#allocation5 + $0x128] ss:$20 sps:$4 sm:$0xff]  }
  0xcf   : > { %934 = vmatprep.subr.bf16.mxu1 %v2407_v37  ;;  %789 = vmatprep.subr.bf16.mxu0 %v2409_v38  ;;  %v1717_v31 = vld [vmem:[#allocation10 + $0x50] sm:$0xff] }
  0xd0   : > { %401 = vperm.xlu1 %2376, %v352_v22   ;;  %398 = vperm.xlu0 %2375, %v351_v24  }
  0xd2   : > { %935 = vmatpush1.bf16.msra.mxu1 %v2411_v39  ;;  %790 = vmatpush1.bf16.msra.mxu0 %v2412_v42  ;;  %v2695_v42 = vmov 0.0|0.0  }
  0xd3   : > { %936 = vmatprep.subr.bf16.mxu1 %v2413_v43  ;;  %791 = vmatprep.subr.bf16.mxu0 %v2415_v44 }
  0xd4   : > { %407 = vperm.xlu1 %2376, %v354_v27   ;;  %404 = vperm.xlu0 %2375, %v353_v28  }
  0xd6   : > { %937 = vmatpush1.bf16.msra.mxu1 %v2417_v45  ;;  %792 = vmatpush1.bf16.msra.mxu0 %v2418_v46  ;;  %v1709_v45 = vld [vmem:[#allocation10 + $0x10] sm:$0xff]  ;;  %v1710_v46 = vld [vmem:[#allocation10 + $0x18] sm:$0xff] }
  0xd7   : > { %938 = vmatprep.subr.bf16.mxu1 %v2419_v49  ;;  %793 = vmatprep.subr.bf16.mxu0 %v2421_v50  ;;  %v2231_v49 = vpack.c.bf16 %v1710_v46, %v1709_v45 }
  0xd8   : > { %413 = vperm.xlu1 %2376, %v356_v34   ;;  %410 = vperm.xlu0 %2375, %v355_v36  }
  0xda   : > { %939 = vmatpush1.bf16.msra.mxu1 %v2423_v51  ;;  %794 = vmatpush1.bf16.msra.mxu0 %v2424_v52 }
  0xdb   : > { %2251 = vmatprep.subr.bf16.mxu1 %v2425_v55  ;;  %2152 = vmatprep.subr.bf16.mxu0 %v2425_v55 }
  0xdc   : > { %419 = vperm.xlu1 %2376, %v358_v40   ;;  %416 = vperm.xlu0 %2375, %v357_v41   ;;  %v1708_v40 = vld [vmem:[#allocation10 + $0x8] sm:$0xff] }
  0xe0   : > { %425 = vperm.xlu1 %2376, %v360_v47   ;;  %422 = vperm.xlu0 %2375, %v359_v48  }
  0xe4   : > { %431 = vperm.xlu1 %2376, %v362_v53   ;;  %428 = vperm.xlu0 %2375, %v361_v54  }
  0xe8   : > { %437 = vperm.xlu1 %2376, %v364_v56   ;;  %434 = vperm.xlu0 %2375, %v363_v57  }
 0x13b   : > { %v369_v59 = vpop.permute.xlu0 %368  ;;  %v375_v62 = vpop.permute.xlu1 %374 }
 0x13c   : > { %vm439_vm1 = vcmp.eq.s32.totalorder %v3020_v60, %v369_v59  ;;  %vm441_vm3 = vcmp.eq.s32.totalorder %v3020_v60, %v375_v62 }
 0x13f   : > { %v372_v61 = vpop.permute.xlu0 %371  ;;  %v378_v4 = vpop.permute.xlu1 %377 }
 0x140   : > { %vm440_vm0 = vcmp.eq.s32.totalorder %v3020_v60, %v372_v61  ;;  %vm442_vm4 = vcmp.eq.s32.totalorder %v3020_v60, %v378_v4  ;;  %v1712_v61 = vld [vmem:[#allocation10 + $0x28] sm:$0xff] }
 0x141   : > { %vm3024_vm2 = vmpackc.low %vm440_vm0, %vm439_vm1 }
 0x142   : > { %2037 = vmatmul.mubr.msk.bf16.vlgmr.msra.gmra.mrb[0].mxu0 %vm3024_vm2, %v2694_v2  ;;  %2061 = vmatmul.mubr.msk.bf16.vlgmr.msra.gmra.mrb[0].mxu1 %vm3024_vm2, %v2694_v2  ;;  %vm3038_vm5 = vmpackc.low %vm442_vm4, %vm441_vm3 }
 0x143   : > { %2259 = vmatpush3.bf16.msra.mxu1 %v2425_v55  ;;  %821 = vmatprep.mubr.bf16.mxu0 %v2693_v0  ;;  %v384_v7 = vpop.permute.xlu1 %383  ;;  %v381_v8 = vpop.permute.xlu0 %380 }
 0x144   : > { %966 = vmatprep.mubr.bf16.mxu1 %v2693_v0  ;;  %2153 = vmatpush3.bf16.msra.mxu0 %v2425_v55  ;;  %vm444_vm6 = vcmp.eq.s32.totalorder %v3020_v60, %v384_v7  ;;  %vm443_vm7 = vcmp.eq.s32.totalorder %v3020_v60, %v381_v8  ;;  %v1714_v7 = vld [vmem:[#allocation10 + $0x38] sm:$0xff] }
 0x145   : > { %2252 = vmatprep.subr.bf16.mxu1 %v2426_v1  ;;  %2154 = vmatprep.subr.bf16.mxu0 %v2426_v1  ;;  %vm3052_vm8 = vmpackc.low %vm444_vm6, %vm443_vm7 }
 0x147   : > { %2260 = vmatpush3.bf16.msra.mxu1 %v2426_v1  ;;  %v390_v12 = vpop.permute.xlu1 %389  ;;  %v387_v13 = vpop.permute.xlu0 %386 }
 0x148   : > { %2155 = vmatpush3.bf16.msra.mxu0 %v2426_v1  ;;  %2253 = vmatprep.subr.bf16.mxu1 %v2427_v3  ;;  %vm446_vm9 = vcmp.eq.s32.totalorder %v3020_v60, %v390_v12  ;;  %vm445_vm10 = vcmp.eq.s32.totalorder %v3020_v60, %v387_v13 }
 0x149   : > { %2156 = vmatprep.subr.bf16.mxu0 %v2427_v3  ;;  %vm3066_vm11 = vmpackc.low %vm446_vm9, %vm445_vm10 }
 0x14a   : > { %2039 = vmatmul.mubr.msk.bf16.gmra.mrb[4].mxu0 %vm3038_vm5, %v2694_v2  ;;  %2063 = vmatmul.mubr.msk.bf16.gmra.mrb[4].mxu1 %vm3038_vm5, %v2694_v2 }
 0x14b   : > { %830 = vmatprep.mubr.bf16.mxu0 %v2693_v0  ;;  %976 = vmatprep.mubr.bf16.mxu1 %v2693_v0  ;;  %v396_v17 = vpop.permute.xlu1 %395  ;;  %v393_v18 = vpop.permute.xlu0 %392 }
 0x14c   : > { %2261 = vmatpush3.bf16.msra.mxu1 %v2427_v3  ;;  %2157 = vmatpush3.bf16.msra.mxu0 %v2427_v3  ;;  %vm448_vm12 = vcmp.eq.s32.totalorder %v3020_v60, %v396_v17  ;;  %vm447_vm13 = vcmp.eq.s32.totalorder %v3020_v60, %v393_v18 }
 0x14d   : > { %2254 = vmatprep.subr.bf16.mxu1 %v2428_v6  ;;  %2158 = vmatprep.subr.bf16.mxu0 %v2428_v6  ;;  %vm3080_vm14 = vmpackc.low %vm448_vm12, %vm447_vm13 }
 0x14f   : > { %v402_v20 = vpop.permute.xlu1 %401  ;;  %v399_v21 = vpop.permute.xlu0 %398 }
 0x150   : > { %2262 = vmatpush3.bf16.msra.mxu1 %v2428_v6  ;;  %2159 = vmatpush3.bf16.msra.mxu0 %v2428_v6  ;;  %vm450_vm15 = vcmp.eq.s32.totalorder %v3020_v60, %v402_v20  ;;  %vm449_vm0 = vcmp.eq.s32.totalorder %v3020_v60, %v399_v21  ;;  %v1713_v6 = vld [vmem:[#allocation10 + $0x30] sm:$0xff] }
 0x151   : > { %2255 = vmatprep.subr.bf16.mxu1 %v2429_v9  ;;  %2160 = vmatprep.subr.bf16.mxu0 %v2429_v9  ;;  %vm3094_vm1 = vmpackc.low %vm450_vm15, %vm449_vm0  ;;  %v2237_v12 = vpack.c.bf16 %v1714_v7, %v1713_v6 }
 0x152   : > { %2041 = vmatmul.mubr.msk.bf16.gmra.mrb[8].mxu0 %vm3052_vm8, %v2694_v2  ;;  %2065 = vmatmul.mubr.msk.bf16.gmra.mrb[8].mxu1 %vm3052_vm8, %v2694_v2 }
 0x153   : > { %839 = vmatprep.mubr.bf16.mxu0 %v2693_v0  ;;  %986 = vmatprep.mubr.bf16.mxu1 %v2693_v0  ;;  %v408_v23 = vpop.permute.xlu1 %407  ;;  %v405_v24 = vpop.permute.xlu0 %404 }
 0x154   : > { %2263 = vmatpush3.bf16.msra.mxu1 %v2429_v9  ;;  %2161 = vmatpush3.bf16.msra.mxu0 %v2429_v9  ;;  %vm452_vm3 = vcmp.eq.s32.totalorder %v3020_v60, %v408_v23  ;;  %vm451_vm4 = vcmp.eq.s32.totalorder %v3020_v60, %v405_v24  ;;  %v1715_v23 = vld [vmem:[#allocation10 + $0x40] sm:$0xff]  ;;  %v1716_v24 = vld [vmem:[#allocation10 + $0x48] sm:$0xff] }
 0x155   : > { %2256 = vmatprep.subr.bf16.mxu1 %v2430_v11  ;;  %2162 = vmatprep.subr.bf16.mxu0 %v2430_v11  ;;  %vm3108_vm6 = vmpackc.low %vm452_vm3, %vm451_vm4 }
 0x157   : > { %v414_v26 = vpop.permute.xlu1 %413  ;;  %v411_v27 = vpop.permute.xlu0 %410 }
 0x158   : > { %2264 = vmatpush3.bf16.msra.mxu1 %v2430_v11  ;;  %2163 = vmatpush3.bf16.msra.mxu0 %v2430_v11  ;;  %vm454_vm7 = vcmp.eq.s32.totalorder %v3020_v60, %v414_v26  ;;  %vm453_vm9 = vcmp.eq.s32.totalorder %v3020_v60, %v411_v27  ;;  %v2240_v26 = vpack.c.bf16 %v1716_v24, %v1715_v23 }
 0x159   : > { %2257 = vmatprep.subr.bf16.mxu1 %v2431_v14  ;;  %2164 = vmatprep.subr.bf16.mxu0 %v2431_v14  ;;  %vm3122_vm10 = vmpackc.low %vm454_vm7, %vm453_vm9 }
 0x15a   : > { %2043 = vmatmul.mubr.msk.bf16.gmra.mrb[12].mxu0 %vm3066_vm11, %v2694_v2  ;;  %2067 = vmatmul.mubr.msk.bf16.gmra.mrb[12].mxu1 %vm3066_vm11, %v2694_v2 }
 0x15b   : > { %849 = vmatprep.mubr.bf16.mxu0 %v2693_v0  ;;  %996 = vmatprep.mubr.bf16.mxu1 %v2693_v0  ;;  %v420_v29 = vpop.permute.xlu1 %419  ;;  %v417_v30 = vpop.permute.xlu0 %416 }
 0x15c   : > { %2265 = vmatpush3.bf16.msra.mxu1 %v2431_v14  ;;  %2165 = vmatpush3.bf16.msra.mxu0 %v2431_v14  ;;  %vm456_vm12 = vcmp.eq.s32.totalorder %v3020_v60, %v420_v29  ;;  %vm455_vm13 = vcmp.eq.s32.totalorder %v3020_v60, %v417_v30 }
 0x15d   : > { %2258 = vmatprep.subr.bf16.mxu1 %v2432_v16  ;;  %2166 = vmatprep.subr.bf16.mxu0 %v2432_v16  ;;  %vm3136_vm15 = vmpackc.low %vm456_vm12, %vm455_vm13 }
 0x15f   : > { %v426_v32 = vpop.permute.xlu1 %425  ;;  %v423_v33 = vpop.permute.xlu0 %422 }
 0x160   : > { %2266 = vmatpush3.bf16.msra.mxu1 %v2432_v16  ;;  %2167 = vmatpush3.bf16.msra.mxu0 %v2432_v16  ;;  %vm458_vm0 = vcmp.eq.s32.totalorder %v3020_v60, %v426_v32  ;;  %vm457_vm3 = vcmp.eq.s32.totalorder %v3020_v60, %v423_v33  ;;  %v1718_v32 = vld [vmem:[#allocation10 + $0x58] sm:$0xff]  ;;  %v1719_v33 = vld [vmem:[#allocation10 + $0x60] sm:$0xff] }
 0x161   : > { %vm3150_vm4 = vmpackc.low %vm458_vm0, %vm457_vm3  ;;  %2227 = vmatprep.subr.bf16.mxu1 %v2695_v42 }
 0x162   : > { %2045 = vmatmul.mubr.msk.bf16.gmra.mrb[16].mxu0 %vm3080_vm14, %v2694_v2  ;;  %2069 = vmatmul.mubr.msk.bf16.gmra.mrb[16].mxu1 %vm3080_vm14, %v2694_v2 }
 0x163   : > { %858 = vmatprep.mubr.bf16.mxu0 %v2693_v0  ;;  %1006 = vmatprep.mubr.bf16.mxu1 %v2693_v0  ;;  %v432_v35 = vpop.permute.xlu1 %431  ;;  %v429_v36 = vpop.permute.xlu0 %428 }
 0x164   : > { %vm460_vm7 = vcmp.eq.s32.totalorder %v3020_v60, %v432_v35  ;;  %vm459_vm9 = vcmp.eq.s32.totalorder %v3020_v60, %v429_v36 }
 0x165   : > { %vm3164_vm12 = vmpackc.low %vm460_vm7, %vm459_vm9  ;;  %vm1748_vm7 = vcmask 1046534   ;;  %vm1750_vm9 = vcmask 1047559  }
 0x167   : > { %v438_v38 = vpop.permute.xlu1 %437  ;;  %v435_v39 = vpop.permute.xlu0 %434 }
 0x168   : > { %vm462_vm13 = vcmp.eq.s32.totalorder %v3020_v60, %v438_v38  ;;  %vm461_vm0 = vcmp.eq.s32.totalorder %v3020_v60, %v435_v39  ;;  %v1711_v60 = vld [vmem:[#allocation10 + $0x20] sm:$0xff]  ;;  %v2243_v38 = vpack.c.bf16 %v1718_v32, %v1717_v31  ;;  %v1720_v39 = vld [vmem:[#allocation10 + $0x68] sm:$0xff] }
 0x169   : > { %vm2058_vm3 = vmpackc.low %vm462_vm13, %vm461_vm0  ;;  %v2234_v63 = vpack.c.bf16 %v1712_v61, %v1711_v60 }
 0x16a   : > { %2047 = vmatmul.mubr.msk.bf16.gmra.mrb[20].mxu0 %vm3094_vm1, %v2694_v2  ;;  %2071 = vmatmul.mubr.msk.bf16.gmra.mrb[20].mxu1 %vm3094_vm1, %v2694_v2 }
 0x16b   : > { %867 = vmatprep.mubr.bf16.mxu0 %v2693_v0  ;;  %1016 = vmatprep.mubr.bf16.mxu1 %v2693_v0 }
 0x172   : > { %2049 = vmatmul.mubr.msk.bf16.gmra.mrb[24].mxu0 %vm3108_vm6, %v2694_v2  ;;  %2073 = vmatmul.mubr.msk.bf16.gmra.mrb[24].mxu1 %vm3108_vm6, %v2694_v2 }
 0x173   : > { %877 = vmatprep.mubr.bf16.mxu0 %v2693_v0  ;;  %1026 = vmatprep.mubr.bf16.mxu1 %v2693_v0 }
 0x17a   : > { %2051 = vmatmul.mubr.msk.bf16.gmra.mrb[28].mxu0 %vm3122_vm10, %v2694_v2  ;;  %2075 = vmatmul.mubr.msk.bf16.gmra.mrb[28].mxu1 %vm3122_vm10, %v2694_v2 }
 0x17b   : > { %886 = vmatprep.mubr.bf16.mxu0 %v2693_v0  ;;  %1036 = vmatprep.mubr.bf16.mxu1 %v2693_v0 }
 0x182   : > { %2053 = vmatmul.mubr.msk.bf16.gmra.mrb[32].mxu0 %vm3136_vm15, %v2694_v2  ;;  %2077 = vmatmul.mubr.msk.bf16.gmra.mrb[32].mxu1 %vm3136_vm15, %v2694_v2 }
 0x183   : > { %895 = vmatprep.mubr.bf16.mxu0 %v2693_v0  ;;  %1046 = vmatprep.mubr.bf16.mxu1 %v2693_v0 }
 0x18a   : > { %2055 = vmatmul.mubr.msk.bf16.gmra.mrb[36].mxu0 %vm3150_vm4, %v2694_v2  ;;  %2079 = vmatmul.mubr.msk.bf16.gmra.mrb[36].mxu1 %vm3150_vm4, %v2694_v2 }
 0x18b   : > { %905 = vmatprep.mubr.bf16.mxu0 %v2693_v0  ;;  %1056 = vmatprep.mubr.bf16.mxu1 %v2693_v0 }
 0x192   : > { %2057 = vmatmul.mubr.msk.bf16.gmra.mrb[40].mxu0 %vm3164_vm12, %v2694_v2  ;;  %2081 = vmatmul.mubr.msk.bf16.gmra.mrb[40].mxu1 %vm3164_vm12, %v2694_v2 }
 0x193   : > { %914 = vmatprep.mubr.bf16.mxu0 %v2693_v0  ;;  %1066 = vmatprep.mubr.bf16.mxu1 %v2693_v0  ;;  %v1707_v0 = vld [vmem:[#allocation10] sm:$0xff] }
 0x194   : > { %v2228_v41 = vpack.c.bf16 %v1708_v40, %v1707_v0 }
 0x19a   : > { %2059 = vmatmul.mubr.msk.bf16.gmra.mrb[44].mxu0 %vm2058_vm3, %v2694_v2  ;;  %2083 = vmatmul.mubr.msk.bf16.gmra.mrb[44].mxu1 %vm2058_vm3, %v2694_v2 }
 0x19b   : > { %2168 = vmatprep.mubr.msk.bf16.mxu0 %vm3024_vm2, %v2694_v2  ;;  %2176 = vmatprep.mubr.msk.bf16.mxu1 %vm3080_vm14, %v2694_v2  ;;  %vm1327_vm2 = vcmask 1045504   ;;  %vm1521_vm14 = vcmask 1043456  }
 0x1a2   : > { %2169 = vmatmul.mubr.msk.bf16.vlgmr.msra.gmra.mrb[48].mxu0 %vm3038_vm5, %v2694_v2  ;;  %2177 = vmatmul.mubr.msk.bf16.vlgmr.msra.gmra.mrb[48].mxu1 %vm3094_vm1, %v2694_v2  ;;  %vm1230_vm5 = vcmask 1046528   ;;  %vm1738_vm1 = vcmask 1041409  }
 0x1a3   : > { %2172 = vmatprep.mubr.msk.bf16.mxu0 %vm3052_vm8, %v2694_v2  ;;  %2180 = vmatprep.mubr.msk.bf16.mxu1 %vm3108_vm6, %v2694_v2  ;;  %vm1424_vm8 = vcmask 1044480   ;;  %vm1740_vm6 = vcmask 1042434  }
 0x1a4   : > { %2229 = vmatpush3.bf16.msra.mxu1 %v2228_v41 }
 0x1a5   : > { %2230 = vmatprep.subr.bf16.mxu1 %v2695_v42 }
 0x1a8   : > { %2232 = vmatpush3.bf16.msra.mxu1 %v2231_v49 }
 0x1a9   : > { %2233 = vmatprep.subr.bf16.mxu1 %v2695_v42 }
 0x1aa   : > { %2173 = vmatmul.mubr.msk.bf16.gmra.mrb[52].mxu0 %vm3066_vm11, %v2694_v2  ;;  %2181 = vmatmul.mubr.msk.bf16.gmra.mrb[52].mxu1 %vm3122_vm10, %v2694_v2  ;;  %vm2696_vm11 = vmmov 0   ;;  %vm1742_vm10 = vcmask 1043459  }
 0x1ab   : > { %2184 = vmatprep.mubr.msk.bf16.mxu1 %vm3136_vm15, %v2694_v2  ;;  %vm1744_vm15 = vcmask 1044484  }
 0x1ac   : > { %2235 = vmatpush3.bf16.msra.mxu1 %v2234_v63 }
 0x1ad   : > { %2236 = vmatprep.subr.bf16.mxu1 %v2695_v42 }
 0x1b0   : > { %2238 = vmatpush3.bf16.msra.mxu1 %v2237_v12 }
 0x1b1   : > { %2239 = vmatprep.subr.bf16.mxu1 %v2695_v42 }
 0x1b2   : > { %2185 = vmatmul.mubr.msk.bf16.gmra.mrb[56].mxu1 %vm3150_vm4, %v2694_v2  ;;  %vm1746_vm4 = vcmask 1045509  }
 0x1b3   : > { %2188 = vmatprep.mubr.msk.bf16.mxu1 %vm3164_vm12, %v2694_v2 }
 0x1b4   : > { %2241 = vmatpush3.bf16.msra.mxu1 %v2240_v26 }
 0x1b5   : > { %2242 = vmatprep.subr.bf16.mxu1 %v2695_v42 }
 0x1b8   : > { %2244 = vmatpush3.bf16.msra.mxu1 %v2243_v38 }
 0x1b9   : > { %2245 = vmatprep.subr.bf16.mxu1 %v2695_v42 }
 0x1ba   : > { %2189 = vmatmul.mubr.msk.bf16.gmra.mrb[60].mxu1 %vm2058_vm3, %v2694_v2 }
 0x215   : > { %v813_v43 = vpop.f32.mrb[0].mxu0  ;;  %v958_v44 = vpop.f32.mrb[0].mxu1 }
 0x216   : > { %v815_v47 = vpop.f32.mrb[1].mxu0  ;;  %v960_v48 = vpop.f32.mrb[1].mxu1  ;;  %v1328_v52 = vrot.slane %v958_v44, 2 }
 0x217   : > { %v817_v50 = vpop.f32.mrb[2].mxu0  ;;  %v962_v51 = vpop.f32.mrb[2].mxu1  ;;  %v1231_v56 = vrot.slane %v815_v47, 1  ;;  %v1425_v57 = vrot.slane %v960_v48, 3 }
 0x218   : > { %v1329_v53 = vrot.slane %v962_v51, 2  ;;  %v819_v54 = vpop.f32.mrb[3].mxu0  ;;  %v964_v55 = vpop.f32.mrb[3].mxu1 }
 0x219   : > { %v1232_v58 = vrot.slane %v819_v54, 1  ;;  %v1426_v59 = vrot.slane %v964_v55, 3  ;;  %v1721_v55 = vld [vmem:[#allocation10 + $0x70] sm:$0xff] }
 0x21a   : > { %v1330_v62 = vsel %vm1327_vm2, %v1328_v52, %v1329_v53 }
 0x21b   : > { %v1233_v1 = vsel %vm1230_vm5, %v1231_v56, %v1232_v58  ;;  %v1427_v2 = vsel %vm1424_vm8, %v1425_v57, %v1426_v59  ;;  %v1722_v56 = vld [vmem:[#allocation10 + $0x78] sm:$0xff]  ;;  %v2697_v57 = vmov 0.0  }
 0x21c   : > { %v1287_v3 = vadd.f32 %v1233_v1, %v813_v43  ;;  %2224 = vmatprep.mubr.msk.f32.mxu1 %vm2696_vm11, %v2697_v57  ;;  %v2249_v1 = vpack.c.bf16 %v1722_v56, %v1721_v55 }
 0x21d   : > { %v823_v4 = vpop.f32.mrb[4].mxu0  ;;  %v968_v5 = vpop.f32.mrb[4].mxu1 }
 0x21e   : > { %v1384_v8 = vadd.f32 %v1330_v62, %v1287_v3  ;;  %v1331_v9 = vrot.slane %v968_v5, 2  ;;  %v824_v10 = vpop.f32.mrb[5].mxu0  ;;  %v970_v11 = vpop.f32.mrb[5].mxu1 }
 0x21f   : > { %v1234_v13 = vrot.slane %v824_v10, 1  ;;  %v1428_v14 = vrot.slane %v970_v11, 3  ;;  %v826_v15 = vpop.f32.mrb[6].mxu0  ;;  %v972_v16 = vpop.f32.mrb[6].mxu1 }
 0x220   : > { %v3221_v17 = vadd.f32 %v1427_v2, %v1384_v8  ;;  %v1332_v18 = vsel %vm1327_vm2, %v1329_v53, %v1331_v9  ;;  %v828_v19 = vpop.f32.mrb[7].mxu0  ;;  %v974_v20 = vpop.f32.mrb[7].mxu1  ;;  %v1333_v28 = vrot.slane %v972_v16, 2 }
 0x221   : > { %v1235_v21 = vsel %vm1230_vm5, %v1232_v58, %v1234_v13  ;;  %v1429_v22 = vsel %vm1424_vm8, %v1426_v59, %v1428_v14  ;;  %v1236_v0 = vrot.slane %v828_v19, 1  ;;  %v1430_v40 = vrot.slane %v974_v20, 3 }
 0x222   : > { %v1288_v25 = vadd.f32 %v1235_v21, %v817_v50  ;;  %v2246_v50 = vpack.c.bf16 %v1720_v39, %v1719_v33 }
 0x224   : > { %v1385_v27 = vadd.f32 %v1332_v18, %v1288_v25  ;;  %2247 = vmatpush3.bf16.msra.mxu1 %v2246_v50 }
 0x225   : > { %v832_v29 = vpop.f32.mrb[8].mxu0  ;;  %v978_v30 = vpop.f32.mrb[8].mxu1  ;;  %2248 = vmatprep.subr.bf16.mxu1 %v2695_v42 }
 0x226   : > { %v3228_v34 = vadd.f32 %v1429_v22, %v1385_v27  ;;  %v1334_v35 = vrot.slane %v978_v30, 2  ;;  %v834_v36 = vpop.f32.mrb[9].mxu0  ;;  %v980_v37 = vpop.f32.mrb[9].mxu1 }
 0x227   : > { %v1237_v41 = vrot.slane %v834_v36, 1  ;;  %v1431_v43 = vrot.slane %v980_v37, 3  ;;  %v836_v44 = vpop.f32.mrb[10].mxu0  ;;  %v982_v45 = vpop.f32.mrb[10].mxu1 }
 0x228   : > { %v1335_v46 = vsel %vm1327_vm2, %v1333_v28, %v1334_v35  ;;  %v1336_v47 = vrot.slane %v982_v45, 2  ;;  %v837_v48 = vpop.f32.mrb[11].mxu0  ;;  %v984_v49 = vpop.f32.mrb[11].mxu1  ;;  %2250 = vmatpush3.bf16.msra.mxu1 %v2249_v1 }
 0x229   : > { %v1238_v51 = vsel %vm1230_vm5, %v1236_v0, %v1237_v41  ;;  %v1432_v52 = vsel %vm1424_vm8, %v1430_v40, %v1431_v43  ;;  %v1239_v53 = vrot.slane %v837_v48, 1  ;;  %v1433_v54 = vrot.slane %v984_v49, 3 }
 0x22a   : > { %v1289_v58 = vadd.f32 %v1238_v51, %v826_v15  ;;  %v1337_v59 = vsel %vm1327_vm2, %v1334_v35, %v1336_v47 }
 0x22b   : > { %v1240_v60 = vsel %vm1230_vm5, %v1237_v41, %v1239_v53  ;;  %v1434_v61 = vsel %vm1424_vm8, %v1431_v43, %v1433_v54 }
 0x22c   : > { %v1386_v62 = vadd.f32 %v1335_v46, %v1289_v58  ;;  %v1290_v63 = vadd.f32 %v1240_v60, %v832_v29 }
 0x22d   : > { %v841_v2 = vpop.f32.mrb[12].mxu0  ;;  %v988_v3 = vpop.f32.mrb[12].mxu1 }
 0x22e   : > { %v3238_v4 = vadd.f32 %v1432_v52, %v1386_v62  ;;  %v1387_v5 = vadd.f32 %v1337_v59, %v1290_v63  ;;  %v843_v6 = vpop.f32.mrb[13].mxu0  ;;  %v990_v7 = vpop.f32.mrb[13].mxu1  ;;  %v1338_v11 = vrot.slane %v988_v3, 2 }
 0x22f   : > { %v845_v8 = vpop.f32.mrb[14].mxu0  ;;  %v992_v9 = vpop.f32.mrb[14].mxu1  ;;  %v1241_v15 = vrot.slane %v843_v6, 1  ;;  %v1435_v16 = vrot.slane %v990_v7, 3 }
 0x230   : > { %v3240_v10 = vadd.f32 %v1434_v61, %v1387_v5  ;;  %v1339_v12 = vrot.slane %v992_v9, 2  ;;  %v847_v13 = vpop.f32.mrb[15].mxu0  ;;  %v994_v14 = vpop.f32.mrb[15].mxu1 }
 0x231   : > { %v1242_v18 = vrot.slane %v847_v13, 1  ;;  %v1436_v19 = vrot.slane %v994_v14, 3 }
 0x232   : > { %v1340_v42 = vsel %vm1327_vm2, %v1338_v11, %v1339_v12 }
 0x233   : > { %v1243_v20 = vsel %vm1230_vm5, %v1241_v15, %v1242_v18  ;;  %v1437_v21 = vsel %vm1424_vm8, %v1435_v16, %v1436_v19 }
 0x234   : > { %v1291_v22 = vadd.f32 %v1243_v20, %v841_v2 }
 0x235   : > { %v851_v23 = vpop.f32.mrb[16].mxu0  ;;  %v998_v24 = vpop.f32.mrb[16].mxu1 }
 0x236   : > { %v1388_v25 = vadd.f32 %v1340_v42, %v1291_v22  ;;  %v1341_v26 = vrot.slane %v998_v24, 2  ;;  %v852_v27 = vpop.f32.mrb[17].mxu0  ;;  %v1000_v28 = vpop.f32.mrb[17].mxu1 }
 0x237   : > { %v1244_v29 = vrot.slane %v852_v27, 1  ;;  %v1438_v30 = vrot.slane %v1000_v28, 3  ;;  %v854_v31 = vpop.f32.mrb[18].mxu0  ;;  %v1002_v32 = vpop.f32.mrb[18].mxu1 }
 0x238   : > { %v3245_v33 = vadd.f32 %v1437_v21, %v1388_v25  ;;  %v1342_v35 = vsel %vm1327_vm2, %v1339_v12, %v1341_v26  ;;  %v856_v36 = vpop.f32.mrb[19].mxu0  ;;  %v1004_v37 = vpop.f32.mrb[19].mxu1  ;;  %v1343_v45 = vrot.slane %v1002_v32, 2 }
 0x239   : > { %v1245_v38 = vsel %vm1230_vm5, %v1242_v18, %v1244_v29  ;;  %v1439_v39 = vsel %vm1424_vm8, %v1436_v19, %v1438_v30  ;;  %v1246_v49 = vrot.slane %v856_v36, 1  ;;  %v1440_v50 = vrot.slane %v1004_v37, 3 }
 0x23a   : > { %v1292_v0 = vadd.f32 %v1245_v38, %v845_v8 }
 0x23c   : > { %v1389_v40 = vadd.f32 %v1342_v35, %v1292_v0 }
 0x23d   : > { %v860_v41 = vpop.f32.mrb[20].mxu0  ;;  %v1008_v43 = vpop.f32.mrb[20].mxu1 }
 0x23e   : > { %v3250_v44 = vadd.f32 %v1439_v39, %v1389_v40  ;;  %v1344_v46 = vrot.slane %v1008_v43, 2  ;;  %v862_v47 = vpop.f32.mrb[21].mxu0  ;;  %v1010_v48 = vpop.f32.mrb[21].mxu1 }
 0x23f   : > { %v1247_v51 = vrot.slane %v862_v47, 1  ;;  %v1441_v52 = vrot.slane %v1010_v48, 3  ;;  %v864_v53 = vpop.f32.mrb[22].mxu0  ;;  %v1012_v54 = vpop.f32.mrb[22].mxu1 }
 0x240   : > { %v1345_v55 = vsel %vm1327_vm2, %v1343_v45, %v1344_v46  ;;  %v1346_v56 = vrot.slane %v1012_v54, 2  ;;  %v865_v57 = vpop.f32.mrb[23].mxu0  ;;  %v1014_v58 = vpop.f32.mrb[23].mxu1 }
 0x241   : > { %v1248_v59 = vsel %vm1230_vm5, %v1246_v49, %v1247_v51  ;;  %v1442_v60 = vsel %vm1424_vm8, %v1440_v50, %v1441_v52  ;;  %v1249_v61 = vrot.slane %v865_v57, 1  ;;  %v1443_v62 = vrot.slane %v1014_v58, 3 }
 0x242   : > { %v1293_v63 = vadd.f32 %v1248_v59, %v854_v31  ;;  %v1347_v1 = vsel %vm1327_vm2, %v1344_v46, %v1346_v56 }
 0x243   : > { %v1250_v2 = vsel %vm1230_vm5, %v1247_v51, %v1249_v61  ;;  %v1444_v3 = vsel %vm1424_vm8, %v1441_v52, %v1443_v62 }
 0x244   : > { %v1390_v5 = vadd.f32 %v1345_v55, %v1293_v63  ;;  %v1294_v6 = vadd.f32 %v1250_v2, %v860_v41 }
 0x245   : > { %v869_v7 = vpop.f32.mrb[24].mxu0  ;;  %v1018_v8 = vpop.f32.mrb[24].mxu1 }
 0x246   : > { %v3258_v9 = vadd.f32 %v1442_v60, %v1390_v5  ;;  %v1391_v11 = vadd.f32 %v1347_v1, %v1294_v6  ;;  %v871_v12 = vpop.f32.mrb[25].mxu0  ;;  %v1020_v13 = vpop.f32.mrb[25].mxu1  ;;  %v1348_v18 = vrot.slane %v1018_v8, 2 }
 0x247   : > { %v873_v14 = vpop.f32.mrb[26].mxu0  ;;  %v1022_v15 = vpop.f32.mrb[26].mxu1  ;;  %v1251_v21 = vrot.slane %v871_v12, 1  ;;  %v1445_v22 = vrot.slane %v1020_v13, 3 }
 0x248   : > { %v3260_v16 = vadd.f32 %v1444_v3, %v1391_v11  ;;  %v1349_v19 = vrot.slane %v1022_v15, 2  ;;  %v875_v42 = vpop.f32.mrb[27].mxu0  ;;  %v1024_v20 = vpop.f32.mrb[27].mxu1 }
 0x249   : > { %v1252_v23 = vrot.slane %v875_v42, 1  ;;  %v1446_v24 = vrot.slane %v1024_v20, 3 }
 0x24a   : > { %v1350_v25 = vsel %vm1327_vm2, %v1348_v18, %v1349_v19 }
 0x24b   : > { %v1253_v26 = vsel %vm1230_vm5, %v1251_v21, %v1252_v23  ;;  %v1447_v27 = vsel %vm1424_vm8, %v1445_v22, %v1446_v24 }
 0x24c   : > { %v1295_v28 = vadd.f32 %v1253_v26, %v869_v7 }
 0x24d   : > { %v879_v29 = vpop.f32.mrb[28].mxu0  ;;  %v1028_v30 = vpop.f32.mrb[28].mxu1 }
 0x24e   : > { %v1392_v31 = vadd.f32 %v1350_v25, %v1295_v28  ;;  %v1351_v32 = vrot.slane %v1028_v30, 2  ;;  %v880_v35 = vpop.f32.mrb[29].mxu0  ;;  %v1030_v36 = vpop.f32.mrb[29].mxu1 }
 0x24f   : > { %v1254_v37 = vrot.slane %v880_v35, 1  ;;  %v1448_v38 = vrot.slane %v1030_v36, 3  ;;  %v882_v39 = vpop.f32.mrb[30].mxu0  ;;  %v1032_v0 = vpop.f32.mrb[30].mxu1 }
 0x250   : > { %v3265_v40 = vadd.f32 %v1447_v27, %v1392_v31  ;;  %v1352_v41 = vsel %vm1327_vm2, %v1349_v19, %v1351_v32  ;;  %v884_v43 = vpop.f32.mrb[31].mxu0  ;;  %v1034_v45 = vpop.f32.mrb[31].mxu1  ;;  %v1353_v53 = vrot.slane %v1032_v0, 2 }
 0x251   : > { %v1255_v46 = vsel %vm1230_vm5, %v1252_v23, %v1254_v37  ;;  %v1449_v47 = vsel %vm1424_vm8, %v1446_v24, %v1448_v38  ;;  %v1256_v57 = vrot.slane %v884_v43, 1  ;;  %v1450_v58 = vrot.slane %v1034_v45, 3 }
 0x252   : > { %v1296_v48 = vadd.f32 %v1255_v46, %v873_v14 }
 0x254   : > { %v1393_v49 = vadd.f32 %v1352_v41, %v1296_v48 }
 0x255   : > { %v888_v50 = vpop.f32.mrb[32].mxu0  ;;  %v1038_v51 = vpop.f32.mrb[32].mxu1 }
 0x256   : > { %v3270_v52 = vadd.f32 %v1449_v47, %v1393_v49  ;;  %v1354_v54 = vrot.slane %v1038_v51, 2  ;;  %v890_v55 = vpop.f32.mrb[33].mxu0  ;;  %v1040_v56 = vpop.f32.mrb[33].mxu1 }
 0x257   : > { %v1257_v59 = vrot.slane %v890_v55, 1  ;;  %v1451_v60 = vrot.slane %v1040_v56, 3  ;;  %v892_v61 = vpop.f32.mrb[34].mxu0  ;;  %v1042_v62 = vpop.f32.mrb[34].mxu1 }
 0x258   : > { %v1355_v63 = vsel %vm1327_vm2, %v1353_v53, %v1354_v54  ;;  %v1356_v1 = vrot.slane %v1042_v62, 2  ;;  %v893_v2 = vpop.f32.mrb[35].mxu0  ;;  %v1044_v3 = vpop.f32.mrb[35].mxu1 }
 0x259   : > { %v1258_v5 = vsel %vm1230_vm5, %v1256_v57, %v1257_v59  ;;  %v1452_v6 = vsel %vm1424_vm8, %v1450_v58, %v1451_v60  ;;  %v1259_v7 = vrot.slane %v893_v2, 1  ;;  %v1453_v8 = vrot.slane %v1044_v3, 3 }
 0x25a   : > { %v1297_v11 = vadd.f32 %v1258_v5, %v882_v39  ;;  %v1357_v12 = vsel %vm1327_vm2, %v1354_v54, %v1356_v1 }
 0x25b   : > { %v1260_v13 = vsel %vm1230_vm5, %v1257_v59, %v1259_v7  ;;  %v1454_v14 = vsel %vm1424_vm8, %v1451_v60, %v1453_v8 }
 0x25c   : > { %v1394_v15 = vadd.f32 %v1355_v63, %v1297_v11  ;;  %v1298_v18 = vadd.f32 %v1260_v13, %v888_v50 }
 0x25d   : > { %v897_v19 = vpop.f32.mrb[36].mxu0  ;;  %v1048_v42 = vpop.f32.mrb[36].mxu1 }
 0x25e   : > { %v3278_v20 = vadd.f32 %v1452_v6, %v1394_v15  ;;  %v1395_v21 = vadd.f32 %v1357_v12, %v1298_v18  ;;  %v899_v22 = vpop.f32.mrb[37].mxu0  ;;  %v1050_v23 = vpop.f32.mrb[37].mxu1  ;;  %v1358_v27 = vrot.slane %v1048_v42, 2 }
 0x25f   : > { %v901_v24 = vpop.f32.mrb[38].mxu0  ;;  %v1052_v25 = vpop.f32.mrb[38].mxu1  ;;  %v1261_v31 = vrot.slane %v899_v22, 1  ;;  %v1455_v32 = vrot.slane %v1050_v23, 3 }
 0x260   : > { %v3280_v26 = vadd.f32 %v1454_v14, %v1395_v21  ;;  %v1359_v28 = vrot.slane %v1052_v25, 2  ;;  %v903_v29 = vpop.f32.mrb[39].mxu0  ;;  %v1054_v30 = vpop.f32.mrb[39].mxu1 }
 0x261   : > { %v1262_v35 = vrot.slane %v903_v29, 1  ;;  %v1456_v36 = vrot.slane %v1054_v30, 3 }
 0x262   : > { %v1360_v37 = vsel %vm1327_vm2, %v1358_v27, %v1359_v28 }
 0x263   : > { %v1263_v38 = vsel %vm1230_vm5, %v1261_v31, %v1262_v35  ;;  %v1457_v39 = vsel %vm1424_vm8, %v1455_v32, %v1456_v36 }
 0x264   : > { %v1299_v0 = vadd.f32 %v1263_v38, %v897_v19 }
 0x265   : > { %v907_v41 = vpop.f32.mrb[40].mxu0  ;;  %v1058_v43 = vpop.f32.mrb[40].mxu1 }
 0x266   : > { %v1396_v45 = vadd.f32 %v1360_v37, %v1299_v0  ;;  %v1361_v46 = vrot.slane %v1058_v43, 2  ;;  %v908_v47 = vpop.f32.mrb[41].mxu0  ;;  %v1060_v48 = vpop.f32.mrb[41].mxu1 }
 0x267   : > { %v1264_v49 = vrot.slane %v908_v47, 1  ;;  %v1458_v50 = vrot.slane %v1060_v48, 3  ;;  %v910_v51 = vpop.f32.mrb[42].mxu0  ;;  %v1062_v53 = vpop.f32.mrb[42].mxu1 }
 0x268   : > { %v3285_v54 = vadd.f32 %v1457_v39, %v1396_v45  ;;  %v1362_v55 = vsel %vm1327_vm2, %v1359_v28, %v1361_v46  ;;  %v912_v56 = vpop.f32.mrb[43].mxu0  ;;  %v1064_v57 = vpop.f32.mrb[43].mxu1  ;;  %v1363_v2 = vrot.slane %v1062_v53, 2 }
 0x269   : > { %v1265_v58 = vsel %vm1230_vm5, %v1262_v35, %v1264_v49  ;;  %v1459_v59 = vsel %vm1424_vm8, %v1456_v36, %v1458_v50  ;;  %v1266_v7 = vrot.slane %v912_v56, 1  ;;  %v1460_v8 = vrot.slane %v1064_v57, 3  ;;  %v3303_v56 = vld [vmem:[#allocation7] ss:$0 sm:$0xff] }
 0x26a   : > { %v1300_v60 = vadd.f32 %v1265_v58, %v901_v24 }
 0x26c   : > { %v1397_v61 = vadd.f32 %v1362_v55, %v1300_v60 }
 0x26d   : > { %v916_v62 = vpop.f32.mrb[44].mxu0  ;;  %v1068_v63 = vpop.f32.mrb[44].mxu1 }
 0x26e   : > { %v3290_v1 = vadd.f32 %v1459_v59, %v1397_v61  ;;  %v1364_v3 = vrot.slane %v1068_v63, 2  ;;  %v918_v5 = vpop.f32.mrb[45].mxu0  ;;  %v1070_v6 = vpop.f32.mrb[45].mxu1 }
 0x26f   : > { %v1267_v11 = vrot.slane %v918_v5, 1  ;;  %v1461_v12 = vrot.slane %v1070_v6, 3  ;;  %v920_v13 = vpop.f32.mrb[46].mxu0  ;;  %v1072_v14 = vpop.f32.mrb[46].mxu1 }
 0x270   : > { %v1365_v15 = vsel %vm1327_vm2, %v1363_v2, %v1364_v3  ;;  %v1366_v18 = vrot.slane %v1072_v14, 2  ;;  %v921_v19 = vpop.f32.mrb[47].mxu0  ;;  %v1074_v42 = vpop.f32.mrb[47].mxu1 }
 0x271   : > { %v1268_v21 = vsel %vm1230_vm5, %v1266_v7, %v1267_v11  ;;  %v1462_v22 = vsel %vm1424_vm8, %v1460_v8, %v1461_v12  ;;  %v1269_v23 = vrot.slane %v921_v19, 1  ;;  %v1463_v24 = vrot.slane %v1074_v42, 3  ;;  %v3313_v8 = vld [vmem:[#allocation8 + $0x8] sm:$0xff] }
 0x272   : > { %v1301_v25 = vadd.f32 %v1268_v21, %v910_v51  ;;  %v1367_v27 = vsel %vm1327_vm2, %v1364_v3, %v1366_v18 }
 0x273   : > { %v1270_v28 = vsel %vm1230_vm5, %v1267_v11, %v1269_v23  ;;  %v1464_v29 = vsel %vm1424_vm8, %v1461_v12, %v1463_v24  ;;  %v3317_v12 = vld [vmem:[#allocation8] sm:$0xff] }
 0x274   : > { %v1398_v30 = vadd.f32 %v1365_v15, %v1301_v25  ;;  %v1302_v31 = vadd.f32 %v1270_v28, %v916_v62 }
 0x275   : > { %v2170_v32 = vpop.f32.mrb[48].mxu0  ;;  %v2178_v35 = vpop.f32.mrb[48].mxu1 }
 0x276   : > { %v3298_v36 = vadd.f32 %v1462_v22, %v1398_v30  ;;  %v1399_v37 = vadd.f32 %v1367_v27, %v1302_v31  ;;  %v1111_v38 = vpop.f32.mrb[49].mxu0  ;;  %v1143_v39 = vpop.f32.mrb[49].mxu1  ;;  %v1538_v45 = vrot.slane %v2178_v35, 4  ;;  %v1525_v49 = vrot.slane %v2170_v32, 4 }
 0x277   : > { %v2171_v0 = vpop.f32.mrb[50].mxu0  ;;  %v2179_v41 = vpop.f32.mrb[50].mxu1  ;;  %v1522_v50 = vrot.slane %v1111_v38, 4  ;;  %v1535_v2 = vrot.slane %v1143_v39, 4 }
 0x278   : > { %v3300_v43 = vadd.f32 %v1464_v29, %v1399_v37  ;;  %v1540_v46 = vrot.slane %v2179_v41, 4  ;;  %v1114_v47 = vpop.f32.mrb[51].mxu0  ;;  %v1146_v48 = vpop.f32.mrb[51].mxu1  ;;  %v1527_v7 = vrot.slane %v2171_v0, 4 }
 0x279   : > { %v1523_v51 = vrot.slane %v1114_v47, 4  ;;  %v1537_v53 = vrot.slane %v1146_v48, 4 }
 0x27a   : > { %v1541_v55 = vsel %vm1521_vm14, %v1538_v45, %v1540_v46 }
 0x27b   : > { %v1585_v57 = vadd.f32 %v1541_v55, %v3260_v16  ;;  %v1524_v58 = vsel %vm1521_vm14, %v1522_v50, %v1523_v51  ;;  %v1526_v59 = vsel %vm1521_vm14, %v1523_v51, %v1525_v49  ;;  %v1539_v60 = vsel %vm1521_vm14, %v1537_v53, %v1538_v45 }
 0x27c   : > { %v1578_v61 = vadd.f32 %v1524_v58, %v3221_v17  ;;  %v1579_v62 = vadd.f32 %v1526_v59, %v3228_v34  ;;  %v1584_v63 = vadd.f32 %v1539_v60, %v3258_v9 }
 0x27d   : > { %v1608_v3 = vadd.f32 %v3303_v56, %v1585_v57  ;;  %v2174_v5 = vpop.f32.mrb[52].mxu0  ;;  %v2182_v6 = vpop.f32.mrb[52].mxu1 }
 0x27e   : > { %v1601_v16 = vadd.f32 %v3303_v56, %v1578_v61  ;;  %v1602_v11 = vadd.f32 %v3303_v56, %v1579_v62  ;;  %v1607_v17 = vadd.f32 %v3303_v56, %v1584_v63  ;;  %v1127_v13 = vpop.f32.mrb[53].mxu0  ;;  %v1159_v34 = vpop.f32.mrb[53].mxu1  ;;  %v1532_v9 = vrot.slane %v2174_v5, 4 }
 0x27f   : > { %v1624_v14 = vmax.f32 %v1608_v3, 0.0  ;;  %v1545_v15 = vrot.slane %v2182_v6, 4  ;;  %v1528_v18 = vrot.slane %v1127_v13, 4  ;;  %v2175_v19 = vpop.f32.mrb[54].mxu0  ;;  %v3320_v42 = vpop.f32.mrb[54].mxu1  ;;  %v1542_v30 = vrot.slane %v1159_v34, 4 }
 0x280   : > { %v1617_v21 = vmax.f32 %v1601_v16, 0.0  ;;  %v1618_v22 = vmax.f32 %v1602_v11, 0.0  ;;  %v1623_v23 = vmax.f32 %v1607_v17, 0.0  ;;  %v1533_v24 = vrot.slane %v2175_v19, 4  ;;  %v1130_v25 = vpop.f32.mrb[55].mxu0  ;;  %v1162_v27 = vpop.f32.mrb[55].mxu1 }
 0x281   : > { %v1642_v28 = vmul.f32 %v3313_v8, %v1624_v14  ;;  %v1529_v29 = vsel %vm1521_vm14, %v1527_v7, %v1528_v18  ;;  %v1530_v31 = vrot.slane %v1130_v25, 4  ;;  %v1543_v45 = vrot.slane %v1162_v27, 4 }
 0x282   : > { %v1635_v32 = vmul.f32 %v3317_v12, %v1617_v21  ;;  %v1636_v35 = vmul.f32 %v3313_v8, %v1618_v22  ;;  %v1641_v37 = vmul.f32 %v3317_v12, %v1623_v23  ;;  %v1580_v38 = vadd.f32 %v1529_v29, %v3238_v4 }
 0x283   : > { %v1534_v39 = vsel %vm1521_vm14, %v1532_v9, %v1533_v24  ;;  %v1536_v0 = vsel %vm1521_vm14, %v1533_v24, %v1535_v2  ;;  %v1531_v41 = vsel %vm1521_vm14, %v1528_v18, %v1530_v31  ;;  %v1544_v53 = vsel %vm1521_vm14, %v1542_v30, %v1543_v45 }
 0x284   : > { %v1651_v46 = vmax.f32 %v1635_v32, %v1636_v35  ;;  %v1672_v47 = vmax.f32 %v1641_v37, %v1642_v28  ;;  %v1603_v48 = vadd.f32 %v3303_v56, %v1580_v38  ;;  %v1582_v49 = vadd.f32 %v1534_v39, %v3245_v33 }
 0x285   : > { %v1583_v50 = vadd.f32 %v1536_v0, %v3250_v44  ;;  %v1581_v51 = vadd.f32 %v1531_v41, %v3240_v10  ;;  %v1546_v4 = vsel %vm1521_vm14, %v1543_v45, %v1545_v15  ;;  %v2186_v55 = vpop.f32.mrb[56].mxu1  ;;  %v1586_v33 = vadd.f32 %v1544_v53, %v3265_v40 }
 0x286   : > { %v1652_v57 = vrot.slane %v1651_v46, 4  ;;  %v1673_v58 = vrot.slane %v1672_v47, 4  ;;  %v1619_v59 = vmax.f32 %v1603_v48, 0.0  ;;  %v1605_v60 = vadd.f32 %v3303_v56, %v1582_v49  ;;  %v1175_v61 = vpop.f32.mrb[57].mxu1 }
 0x287   : > { %v1606_v62 = vadd.f32 %v3303_v56, %v1583_v50  ;;  %v1604_v63 = vadd.f32 %v3303_v56, %v1581_v51  ;;  %v1587_v44 = vadd.f32 %v1546_v4, %v3270_v52  ;;  %v2187_v10 = vpop.f32.mrb[58].mxu1  ;;  %v1547_v6 = vrot.slane %v3320_v42, 4 }
 0x288   : > { %v1653_v2 = vmax.f32 %v1651_v46, %v1652_v57  ;;  %v1674_v3 = vmax.f32 %v1672_v47, %v1673_v58  ;;  %v1621_v5 = vmax.f32 %v1605_v60, 0.0  ;;  %v1178_v7 = vpop.f32.mrb[59].mxu1  ;;  %v1609_v17 = vadd.f32 %v3303_v56, %v1586_v33 }
 0x289   : > { %v1622_v16 = vmax.f32 %v1606_v62, 0.0  ;;  %v1620_v11 = vmax.f32 %v1604_v63, 0.0  ;;  %v1610_v13 = vadd.f32 %v3303_v56, %v1587_v44  ;;  %v1637_v9 = vmul.f32 %v3317_v12, %v1619_v59 }
 0x28a   : > { %v1654_v34 = vrot.slane %v1653_v2, 2  ;;  %v1675_v14 = vrot.slane %v1674_v3, 2  ;;  %v1639_v40 = vmul.f32 %v3317_v12, %v1621_v5  ;;  %v1625_v18 = vmax.f32 %v1609_v17, 0.0 }
 0x28b   : > { %v1640_v52 = vmul.f32 %v3313_v8, %v1622_v16  ;;  %v1638_v15 = vmul.f32 %v3313_v8, %v1620_v11  ;;  %v1626_v19 = vmax.f32 %v1610_v13, 0.0  ;;  %v1552_v21 = vrot.slane %v2186_v55, 4 }
 0x28c   : > { %v1655_v42 = vmax.f32 %v1653_v2, %v1654_v34  ;;  %v1548_v22 = vrot.slane %v1175_v61, 4  ;;  %v1553_v23 = vrot.slane %v2187_v10, 4  ;;  %v1643_v27 = vmul.f32 %v3317_v12, %v1625_v18 }
 0x28d   : > { %v1665_v24 = vmax.f32 %v1639_v40, %v1640_v52  ;;  %v1658_v25 = vmax.f32 %v1637_v9, %v1638_v15  ;;  %v1644_v28 = vmul.f32 %v3313_v8, %v1626_v19  ;;  %v2190_v29 = vpop.f32.mrb[60].mxu1  ;;  %v1676_v31 = vmax.f32 %v1674_v3, %v1675_v14 }
 0x28e   : > { %v1656_v30 = vrot.slane %v1655_v42, 1  ;;  %v1549_v32 = vsel %vm1521_vm14, %v1547_v6, %v1548_v22  ;;  %v1554_v35 = vsel %vm1521_vm14, %v1552_v21, %v1553_v23  ;;  %v1191_v37 = vpop.f32.mrb[61].mxu1  ;;  %v1550_v47 = vrot.slane %v1178_v7, 4 }
 0x28f   : > { %v1666_v38 = vrot.slane %v1665_v24, 4  ;;  %v1659_v39 = vrot.slane %v1658_v25, 4  ;;  %v1679_v0 = vmax.f32 %v1643_v27, %v1644_v28  ;;  %v1588_v41 = vadd.f32 %v1549_v32, %v3278_v20  ;;  %v2191_v45 = vpop.f32.mrb[62].mxu1 }
 0x290   : > { %v1590_v46 = vadd.f32 %v1554_v35, %v3285_v54  ;;  %v1194_v48 = vpop.f32.mrb[63].mxu1  ;;  %v1677_v4 = vrot.slane %v1676_v31, 1  ;;  %v1551_v57 = vsel %vm1521_vm14, %v1548_v22, %v1550_v47  ;;  %v1555_v58 = vrot.slane %v1191_v37, 4 }
 0x291   : > { %v1667_v49 = vmax.f32 %v1665_v24, %v1666_v38  ;;  %v1660_v50 = vmax.f32 %v1658_v25, %v1659_v39  ;;  %v1680_v51 = vrot.slane %v1679_v0, 4  ;;  %v1611_v53 = vadd.f32 %v3303_v56, %v1588_v41 }
 0x292   : > { %v1613_v55 = vadd.f32 %v3303_v56, %v1590_v46  ;;  %v1657_v20 = vmax.f32 %v1655_v42, %v1656_v30  ;;  %v1589_v61 = vadd.f32 %v1551_v57, %v3280_v26  ;;  %v1558_v62 = vrot.slane %v2190_v29, 4 }
 0x293   : > { %v1668_v59 = vrot.slane %v1667_v49, 2  ;;  %v1661_v60 = vrot.slane %v1660_v50, 2  ;;  %v1681_v54 = vmax.f32 %v1679_v0, %v1680_v51  ;;  %v1556_v63 = vsel %vm1521_vm14, %v1553_v23, %v1555_v58 }
 0x294   : > { %v1560_v33 = vrot.slane %v2191_v45, 4  ;;  %v1627_v3 = vmax.f32 %v1611_v53, 0.0  ;;  %v1629_v5 = vmax.f32 %v1613_v55, 0.0  ;;  %v1612_v6 = vadd.f32 %v3303_v56, %v1589_v61 }
 0x295   : > { %v1669_v44 = vmax.f32 %v1667_v49, %v1668_v59  ;;  %v1662_v10 = vmax.f32 %v1660_v50, %v1661_v60  ;;  %v1682_v2 = vrot.slane %v1681_v54, 2  ;;  %v1591_v7 = vadd.f32 %v1556_v63, %v3290_v1 }
 0x296   : > { %v1561_v16 = vsel %vm1521_vm14, %v1558_v62, %v1560_v33  ;;  %v1678_v34 = vmax.f32 %v1676_v31, %v1677_v4  ;;  %v1628_v14 = vmax.f32 %v1612_v6, 0.0  ;;  %v1557_v40 = vrot.slane %v1194_v48, 4 }
 0x297   : > { %v1670_v11 = vrot.slane %v1669_v44, 1  ;;  %v1663_v17 = vrot.slane %v1662_v10, 1  ;;  %v1683_v13 = vmax.f32 %v1681_v54, %v1682_v2  ;;  %v1593_v26 = vadd.f32 %v1561_v16, %v3300_v43 }
 0x298   : > { %v1614_v9 = vadd.f32 %v3303_v56, %v1591_v7  ;;  %v1645_v18 = vmul.f32 %v3317_v12, %v1627_v3  ;;  %v1646_v1 = vmul.f32 %v3313_v8, %v1628_v14  ;;  %v1559_v22 = vsel %vm1521_vm14, %v1557_v40, %v1558_v62  ;;  %v2109_v62 = vld [vmem:[#allocation11] ss:$0 sm:$0xff] }
 0x299   : > { %v1664_v52 = vmax.f32 %v1662_v10, %v1663_v17  ;;  %v1684_v15 = vrot.slane %v1683_v13, 1  ;;  %v1616_v19 = vadd.f32 %v3303_v56, %v1593_v26  ;;  %v1671_v42 = vmax.f32 %v1669_v44, %v1670_v11 }
 0x29a   : > { %v1630_v21 = vmax.f32 %v1614_v9, 0.0  ;;  %v1647_v23 = vmul.f32 %v3317_v12, %v1629_v5  ;;  %v1592_v24 = vadd.f32 %v1559_v22, %v3298_v36  ;;  %v1686_v27 = vmax.f32 %v1645_v18, %v1646_v1 }
 0x29b   : > { %v1632_v43 = vmax.f32 %v1616_v19, 0.0  ;;  %v1739_v25 = vsel %vm1738_vm1, %v1664_v52, %v1657_v20  ;;  %v1685_v29 = vmax.f32 %v1683_v13, %v1684_v15 }
 0x29c   : > { %v1648_v28 = vmul.f32 %v3313_v8, %v1630_v21  ;;  %v1741_v30 = vsel %vm1740_vm6, %v1671_v42, %v1739_v25  ;;  %v1615_v31 = vadd.f32 %v3303_v56, %v1592_v24  ;;  %v1687_v35 = vrot.slane %v1686_v27, 4 }
 0x29d   : > { %v1743_v32 = vsel %vm1742_vm10, %v1678_v34, %v1741_v30  ;;  %v1650_v39 = vmul.f32 %v3313_v8, %v1632_v43 }
 0x29e   : > { %v1693_v37 = vmax.f32 %v1647_v23, %v1648_v28  ;;  %v1745_v38 = vsel %vm1744_vm15, %v1685_v29, %v1743_v32  ;;  %v1631_v0 = vmax.f32 %v1615_v31, 0.0  ;;  %v1688_v36 = vmax.f32 %v1686_v27, %v1687_v35 }
 0x2a0   : > { %v1694_v41 = vrot.slane %v1693_v37, 4  ;;  %v1649_v45 = vmul.f32 %v3317_v12, %v1631_v0  ;;  %v1689_v46 = vrot.slane %v1688_v36, 2 }
 0x2a2   : > { %v1695_v47 = vmax.f32 %v1693_v37, %v1694_v41  ;;  %v1700_v48 = vmax.f32 %v1649_v45, %v1650_v39  ;;  %v1690_v49 = vmax.f32 %v1688_v36, %v1689_v46 }
 0x2a4   : > { %v1696_v50 = vrot.slane %v1695_v47, 2  ;;  %v1701_v51 = vrot.slane %v1700_v48, 4  ;;  %v1691_v56 = vrot.slane %v1690_v49, 1 }
 0x2a6   : > { %v1697_v53 = vmax.f32 %v1695_v47, %v1696_v50  ;;  %v1702_v4 = vmax.f32 %v1700_v48, %v1701_v51  ;;  %v1692_v55 = vmax.f32 %v1690_v49, %v1691_v56 }
 0x2a8   : > { %v1698_v57 = vrot.slane %v1697_v53, 1  ;;  %v1703_v8 = vrot.slane %v1702_v4, 2  ;;  %v1747_v20 = vsel %vm1746_vm4, %v1692_v55, %v1745_v38 }
 0x2aa   : > { %v1699_v58 = vmax.f32 %v1697_v53, %v1698_v57  ;;  %v1704_v59 = vmax.f32 %v1702_v4, %v1703_v8 }
 0x2ac   : > { %v1749_v12 = vsel %vm1748_vm7, %v1699_v58, %v1747_v20  ;;  %v1705_v60 = vrot.slane %v1704_v59, 1 }
 0x2ae   : > { %v1706_v54 = vmax.f32 %v1704_v59, %v1705_v60 }
 0x2b0   : > { %v1751_v61 = vsel %vm1750_vm9, %v1706_v54, %v1749_v12 }
 0x2b1   : > { %2225 = vmatmul.mubr.f32.vlgmr.msra.gmra.mrb[64].mxu1 %v1751_v61 }
 0x384   : > { %v1819_v63 = vpop.f32.mrb[64].mxu1 }
 0x385   : > { %v1820_v33 = vadd.f32 %v2109_v62, %v1819_v63  ;;  %v2226_v44 = vpop.f32.mrb[65].mxu1 }
 0x387   : > { %1823 = vst [vmem:[%s338_s12] sm:$0xff] %v1820_v33 }
 0x388   : > { %2616 = shalt.err (!%p2613_p8)
}
 0x389   : > { %s2617_s13 = scalar_lea.hbm %s3384_s11, 128  ;;  %s2621_s8 = scalar_lea.hbm %s3434_s6, 256 }
 0x38a   : > { %p2618_p6 = scmp.ne.s32.totalorder %s3384_s11, %s2617_s13  ;;  %p2622_p3 = scmp.lt.u32.totalorder %s3384_s11, %s3434_s6 }
 0x38b   : > { %p2623_p0 = scmp.lt.u32.totalorder %s2621_s8, %s2617_s13  ;;  %p2625_p2 = scmp.lt.u32.totalorder %s2617_s13, %s3384_s11 }
 0x38c   : > { %p2619_p9 = pnand %p2618_p6, %p3479_p7 }
 0x38d   : > { %p2624_p5 = por %p2623_p0, %p2622_p3 }
 0x38e   : > { %p2620_p4 = pneg %p2619_p9 }
 0x38f   : > { %p2626_p10 = por %p2625_p2, %p2624_p5 }
 0x391   : > { %p2627_p1 = pnand %p2626_p10, %p2620_p4 }
 0x393   : > { %2630 = shalt.err (!%p2627_p1)
}
 0x394   : > { %2291 = dma.vmem_to_hbm [thread:$0]  (%p3479_p7), %s3386_s30, 128, %s3384_s11, %s1825_s9  }
 0x395 PF: > { %s1850_s12 = sand.u32 1, %s2669_s21   ;;  %p3480_p11 = scmp.ne.s32.totalorder %s3446_s10, 0 }
 0x396   : > { %p3481_p12 = scmp.ge.s32.totalorder %s2681_s24, 2  ;;  %s1851_s15 = scalar_lea.sflag [#allocation4], %s1850_s12 }
 0x398   : > { %p2314_p13 = pnand %p3481_p12, %p3480_p11 }
 0x39a   : > { %2664 = dma.done.wait (!%p2314_p13), %s1851_s15, 128  }
 0x39b   : > { %2666 = vsyncadd (!%p2314_p13), %s1851_s15, 4294967168  ;;  %p22_p8 = scmp.ge.s32.totalorder %s2894_s7, 4   ;;  %s3482_s21 = smov %s2673_s22 }
 0x39c   : > { %s3483_s22 = smov %s2677_s23  ;;  %s3484_s23 = smov %s2906_s19 }
 0x39d   : > { %s3485_s24 = smov %s2894_s7  ;;  %24 = sbr.rel (!%p22_p8) target bundleno = 8 (0x8), region = 109 }
 0x3a4   :  { %1856 = vsyncpa [#allocation3], 1 }
 0x3a5   :  { %1858 = vsyncpa [#allocation3 + $0x1], 1 }
 0x3a6   :  { %1859 = vsyncpa [#allocation6], 1 }
 0x3a7   :  { %1860 = vsyncpa [#allocation9], 1 }
 0x3a8   :  { %1861 = vsyncpa [#allocation12], 1 }
 0x3a9   :  { %1862 = vsyncpa [#allocation4], 1 }
 0x3aa   :  { %1864 = vsyncpa [#allocation4 + $0x1], 1 }

</bundles_post_ra>
